<compile_context>
chip_gen: v7x
topology: tpu7x:2x2x1
jax: 0.10.0
libtpu: 0.0.40
codegen_flags: <defaults>
</compile_context>

<pallas_src>
import math

import jax
import jax.numpy as jnp
from jax.experimental import pallas as pl
from jax.experimental.pallas import tpu as pltpu

BETA = 100.0          # Softplus beta used by the decoder
THRESH = 20.0         # torch.nn.Softplus default threshold
INV_SQRT2 = 1.0 / math.sqrt(2.0)

# f32 keeps parity with the PyTorch reference.  On v6e/v7x, flip to jnp.bfloat16
# for full-rate MXU (accumulation stays f32 via preferred_element_type).
MATMUL_DTYPE = jnp.float32


def _mm(a, w):
    return jnp.dot(a.astype(MATMUL_DTYPE), w.astype(MATMUL_DTYPE),
                   preferred_element_type=jnp.float32)


def _relu(x):
    return jnp.maximum(x, 0.0)


def _softplus_beta(x):
    # torch.nn.Softplus(beta=BETA, threshold=THRESH)
    bx = BETA * x
    return jnp.where(bx > THRESH, x, jnp.log1p(jnp.exp(jnp.minimum(bx, THRESH))) / BETA)


def _vmem_spec():
    return pl.BlockSpec(memory_space=pltpu.MemorySpace.VMEM)


# ----------------------------------------------------------------------------
# Encoder kernel  (DCDFFN_Encoder forward, whole batch in one program)
# ----------------------------------------------------------------------------
def _make_encoder_kernel(B, N, H):
    def kernel(p_ref, wpos_ref, bpos_ref, w0_ref, b0_ref, w1_ref, b1_ref,
               w2_ref, b2_ref, w3_ref, b3_ref, wms_ref, bms_ref, ms_ref):

        def pool_relu(act):
            # per-batch max over the N points (torch maxpool over dim=2), then ReLU
            rows = [jnp.max(act[b * N:(b + 1) * N], axis=0, keepdims=True)
                    for b in range(B)]
            pooled = rows[0] if B == 1 else jnp.concatenate(rows, axis=0)
            return _relu(pooled)                                      # (B, H)

        def badd(per_point, per_batch):
            # broadcast-add the per-batch (B, C) row to that batch's N rows
            if B == 1:
                return per_point + per_batch
            return jnp.concatenate(
                [per_point[b * N:(b + 1) * N] + per_batch[b:b + 1] for b in range(B)],
                axis=0)

        p = p_ref[...]                                                # (B*N, Din)
        net = _mm(p, wpos_ref[...]) + bpos_ref[...]                   # fc_pos
        net1 = _mm(_relu(net), w0_ref[...]) + b0_ref[...]             # fc_0
        r1 = _relu(net1)

        # fc_1 on cat([net1, pooled1])  ==  r1 @ W1[:H] + relu(max(net1)) @ W1[H:]
        pc = _mm(pool_relu(net1), w1_ref[H:2 * H, :])                 # pooled branch once
        net2 = badd(_mm(r1, w1_ref[0:H, :]), pc) + b1_ref[...]
        r2 = _relu(net2)

        # fc_2 on cat([net1, net2, pooled2])   (split-weight partial matmuls)
        pc = _mm(pool_relu(net2), w2_ref[2 * H:3 * H, :])
        net3 = badd(_mm(r1, w2_ref[0:H, :]) + _mm(r2, w2_ref[H:2 * H, :]), pc) \
            + b2_ref[...]
        r3 = _relu(net3)

        # fc_3 on cat([net1, net2, net3, pooled3])
        pc = _mm(pool_relu(net3), w3_ref[3 * H:4 * H, :])
        net4 = badd(_mm(r1, w3_ref[0:H, :]) + _mm(r2, w3_ref[H:2 * H, :])
                    + _mm(r3, w3_ref[2 * H:3 * H, :]), pc) + b3_ref[...]

        f = pool_relu(net4)                                           # (B, H)
        # fused fc_mean | fc_std head: one (B, H) @ (H, 2*c_dim) matmul
        ms_ref[...] = _mm(f, wms_ref[...]) + bms_ref[...]

    return kernel


def encoder_pallas(p, params):
    """p: (B, N, Din) float32 -> (mean, std) each (B, c_dim)."""
    B, N, Din = p.shape
    H = params['b0'].shape[-1]
    c2 = params['bms'].shape[-1]
    ins = [p.reshape(B * N, Din),
           params['wpos'], params['bpos'], params['w0'], params['b0'],
           params['w1'], params['b1'], params['w2'], params['b2'],
           params['w3'], params['b3'], params['wms'], params['bms']]
    ms = pl.pallas_call(
        _make_encoder_kernel(B, N, H),
        out_shape=jax.ShapeDtypeStruct((B, c2), jnp.float32),
        in_specs=[_vmem_spec() for _ in ins],
        out_specs=_vmem_spec(),
    )(*ins)
    c = c2 // 2
    return ms[:, :c], ms[:, c:]


# ----------------------------------------------------------------------------
# Decoder kernel (DCDFFN_Decoder forward + xyz gradient, all points/batches at once)
# ----------------------------------------------------------------------------
def decoder_kernel(x_ref, *refs):
    """x_ref: (M, 3+latent), xyz in the first 3 columns.

    Output: one lane-dense (4, M) block -- row 0 = sdf pred, rows 1..3 = d/dxyz.
    """
    out_ref = refs[-1]
    wb = refs[:-1]
    nlayers = len(wb) // 2
    M = x_ref.shape[0]

    x = x_ref[...]
    feats = []      # per-stage features, each (M, C_j)
    grads = []      # per-stage grads: 3 xyz planes stacked on rows -> (3M, C_j)

    for l in range(nlayers):
        w = wb[2 * l][...]                        # (in, out)
        b = wb[2 * l + 1][...]                    # (1, out)
        if l == 0:
            h = _mm(x, w) + b
            # torch SoftplusGrad uses sigmoid(beta*x) with no threshold -> match exactly
            s = jax.nn.sigmoid(BETA * h)
            feats.append(_softplus_beta(h))
            # Conv1dGrad(is_first=True): d h / d xyz_d = W[d, :]; 3 planes stacked on rows
            grads.append(jnp.concatenate(
                [s * w[0:1, :], s * w[1:2, :], s * w[2:3, :]], axis=0))
        else:
            # cumulative /sqrt(2) of the whole feature/grad bank (as in torch)
            feats = [f * INV_SQRT2 for f in feats]
            grads = [g * INV_SQRT2 for g in grads]
            # split-weight partial matmuls instead of lane-axis concats of the bank
            off, h, gnew = 0, None, None
            for f, g in zip(feats, grads):
                c = f.shape[-1]
                wpart = w[off:off + c, :]
                hp = _mm(f, wpart)                # (M, out)
                gp = _mm(g, wpart)                # one stacked (3M, c)@(c, out) matmul
                h = hp if h is None else h + hp
                gnew = gp if gnew is None else gnew + gp
                off += c
            h = h + b
            if l < nlayers - 1:
                s = jax.nn.sigmoid(BETA * h)
                feats.append(_softplus_beta(h))
                grads.append(jnp.concatenate([s, s, s], axis=0) * gnew)
            else:
                # last layer: h (M,1), gnew (3M,1).  Emit lane-dense (4, M):
                # pad columns to a full 128-lane tile so the transpose is aligned.
                cols = jnp.concatenate(
                    [h, gnew[0:M, :], gnew[M:2 * M, :], gnew[2 * M:3 * M, :],
                     jnp.zeros((M, 128 - 4), jnp.float32)], axis=1)      # (M, 128)
                out_ref[...] = jnp.transpose(cols)[0:4, :]               # (4, M)


def decoder_pallas(x2d, dec_params):
    """x2d: (M, 3+L) -> (4, M) = [pred; d/dx; d/dy; d/dz] (lane-dense)."""
    M, _ = x2d.shape
    ins = [x2d]
    for (w, bia) in dec_params:
        ins += [w, bia]
    return pl.pallas_call(
        decoder_kernel,
        out_shape=jax.ShapeDtypeStruct((4, M), jnp.float32),
        in_specs=[_vmem_spec() for _ in ins],
        out_specs=_vmem_spec(),
    )(*ins)


# ----------------------------------------------------------------------------
# Deterministic parameter init (shapes follow the torch __init__)
# ----------------------------------------------------------------------------
def init_encoder_params(key, d_in, hidden_dim, c_dim):
    H = hidden_dim
    ks = jax.random.split(key, 5)

    def conv_w(k, fin, fout):
        return (jax.random.normal(k, (fin, fout), jnp.float32)
                * jnp.sqrt(2.0 / fin)).astype(jnp.float32)

    return {
        'wpos': conv_w(ks[0], d_in, 2 * H), 'bpos': jnp.zeros((1, 2 * H), jnp.float32),
        'w0': conv_w(ks[1], 2 * H, H), 'b0': jnp.zeros((1, H), jnp.float32),
        'w1': conv_w(ks[2], 2 * H, H), 'b1': jnp.zeros((1, H), jnp.float32),
        'w2': conv_w(ks[3], 3 * H, H), 'b2': jnp.zeros((1, H), jnp.float32),
        'w3': conv_w(ks[4], 4 * H, H), 'b3': jnp.zeros((1, H), jnp.float32),
        # fused fc_mean | fc_std (torch constant init: W=0, b_mean=0, b_std=-10)
        'wms': jnp.zeros((H, 2 * c_dim), jnp.float32),
        'bms': jnp.concatenate([jnp.zeros((1, c_dim), jnp.float32),
                                jnp.full((1, c_dim), -10.0, jnp.float32)], axis=1),
    }


def init_decoder_params(key, latent_size, dims, xyz_dim=3):
    dims_full = [latent_size + xyz_dim] + list(dims) + [1]
    num_layers = len(dims_full)
    ks = jax.random.split(key, num_layers)
    params = []
    in_dim = 0
    for l in range(num_layers - 1):
        out_dim = dims_full[l + 1]
        if l == 0:
            fan_in = dims_full[0]
            in_dim = out_dim
        elif l < num_layers - 2:
            fan_in = in_dim
            in_dim += out_dim
        else:
            fan_in = in_dim
        if l == num_layers - 2:  # geometric init, last layer
            w = (math.sqrt(math.pi) / math.sqrt(fan_in)
                 + 1e-4 * jax.random.normal(ks[l], (fan_in, out_dim), jnp.float32))
            bia = jnp.full((1, out_dim), -1.0, jnp.float32)
        else:
            w = jax.random.normal(ks[l], (fan_in, out_dim), jnp.float32) * (
                math.sqrt(2.0) / math.sqrt(out_dim))
            bia = jnp.zeros((1, out_dim), jnp.float32)
        params.append((w.astype(jnp.float32), bia))
    return params


# ----------------------------------------------------------------------------
# Network wrapper (mirrors Network.forward, full training path)
# ----------------------------------------------------------------------------
class NetworkPallas:
    def __init__(self, key, latent_size=16, hidden_dim=32, decoder_dims=(64, 64),
                 with_normals=False, predict_normals_on_surface=True):
        self.latent_size = latent_size
        self.with_normals = with_normals
        self.predict_normals_on_surface = predict_normals_on_surface
        enc_dim = 6 if with_normals else 3
        k_enc, k_dec = jax.random.split(key)
        self.enc_params = init_encoder_params(k_enc, enc_dim, hidden_dim, latent_size)
        self.dec_params = init_decoder_params(k_dec, latent_size, decoder_dims)

    def implicit_map(self, points, latent):
        # points: (B, N, 3); latent: (B, L) -> pred (B, 1, N), grad (B, N, 1, 3)
        B, N, _ = points.shape
        lat = jnp.broadcast_to(latent[:, None, :], (B, N, latent.shape[-1]))
        x = jnp.concatenate([points, lat], axis=-1).reshape(B * N, -1)
        out = decoder_pallas(x, self.dec_params)                  # (4, B*N)
        out = out.reshape(4, B, N)
        pred = out[0][:, None, :]                                 # (B, 1, N)  torch layout
        grad = jnp.transpose(out[1:4], (1, 2, 0))[:, :, None, :]  # (B, N, 1, 3)
        return pred, grad

    def forward(self, manifold_points, manifold_normals, sample_nonmnfld, rng):
        output = {}
        enc_in = (jnp.concatenate([manifold_points, manifold_normals], axis=-1)
                  if self.with_normals else manifold_points)
        qlm, qls = encoder_pallas(enc_in, self.enc_params)        # (B, L), (B, L)

        # dist.Normal(qlm, exp(qls)).rsample() -- reparameterized sample in plain JAX
        eps = jax.random.normal(rng, qlm.shape, dtype=qlm.dtype)
        latent = qlm + jnp.exp(qls) * eps

        output['latent_reg'] = jnp.abs(qlm).mean(-1) + jnp.abs(qls + 1.0).mean(-1)
        output['norm_square_latent'] = (latent ** 2).mean(-1)

        # fuse the two decoder invocations (non-manifold + surface) into one call
        n_non = sample_nonmnfld.shape[1]
        if self.predict_normals_on_surface:
            pts = jnp.concatenate([sample_nonmnfld, manifold_points], axis=1)
        else:
            pts = sample_nonmnfld
        pred, grad = self.implicit_map(pts, latent)
        output['non_mnfld_pred'] = pred[:, :, :n_non]             # (B, 1, N_non)
        output['non_mnfld_pred_grad'] = grad[:, :n_non]           # (B, N_non, 1, 3)
        if self.predict_normals_on_surface:
            output['grad_on_surface'] = grad[:, n_non:]           # (B, N_mnfld, 1, 3)
        return output


if __name__ == "__main__":
    key = jax.random.PRNGKey(0)
    k_params, k_pts, k_nrm, k_non, k_rng = jax.random.split(key, 5)

    B, N_mnfld, N_non = 2, 64, 32
    manifold_points = jax.random.normal(k_pts, (B, N_mnfld, 3), jnp.float32)
    manifold_normals = jax.random.normal(k_nrm, (B, N_mnfld, 3), jnp.float32)
    sample_nonmnfld = jax.random.normal(k_non, (B, N_non, 3), jnp.float32)

    net = NetworkPallas(k_params, latent_size=16, hidden_dim=32,
                        decoder_dims=(64, 64), with_normals=False,
                        predict_normals_on_surface=True)

    out = net.forward(manifold_points, manifold_normals, sample_nonmnfld, k_rng)
    out = jax.block_until_ready(out)

    assert out['non_mnfld_pred'].shape == (B, 1, N_non)
    assert out['non_mnfld_pred_grad'].shape == (B, N_non, 1, 3)
    assert out['grad_on_surface'].shape == (B, N_mnfld, 1, 3)
    assert out['latent_reg'].shape == (B,)
    assert out['norm_square_latent'].shape == (B,)
    assert bool(jnp.all(jnp.isfinite(out['non_mnfld_pred'])))
    assert bool(jnp.all(jnp.isfinite(out['non_mnfld_pred_grad'])))
    print("KERNEL_OK")
</pallas_src>

<mosaic_0001>
module attributes {stable_mosaic.version = 11 : i64} {
  func.func @kernel(%arg0: memref<128x3xf32, #tpu.memory_space<vmem>>, %arg1: memref<3x64xf32, #tpu.memory_space<vmem>>, %arg2: memref<1x64xf32, #tpu.memory_space<vmem>>, %arg3: memref<64x32xf32, #tpu.memory_space<vmem>>, %arg4: memref<1x32xf32, #tpu.memory_space<vmem>>, %arg5: memref<64x32xf32, #tpu.memory_space<vmem>>, %arg6: memref<1x32xf32, #tpu.memory_space<vmem>>, %arg7: memref<96x32xf32, #tpu.memory_space<vmem>>, %arg8: memref<1x32xf32, #tpu.memory_space<vmem>>, %arg9: memref<128x32xf32, #tpu.memory_space<vmem>>, %arg10: memref<1x32xf32, #tpu.memory_space<vmem>>, %arg11: memref<32x32xf32, #tpu.memory_space<vmem>>, %arg12: memref<1x32xf32, #tpu.memory_space<vmem>>, %arg13: memref<2x32xf32, #tpu.memory_space<vmem>>) attributes {dimension_semantics = [], scalar_prefetch = 0 : i64, scratch_operands = 0 : i64, tpu.core_type = #tpu.core_type<tc>} {
    %c0 = arith.constant 0 : index
    %c0_0 = arith.constant 0 : index
    %0 = vector.load %arg0[%c0, %c0_0] : memref<128x3xf32, #tpu.memory_space<vmem>>, vector<128x3xf32>
    %c0_1 = arith.constant 0 : index
    %c0_2 = arith.constant 0 : index
    %1 = vector.load %arg1[%c0_1, %c0_2] : memref<3x64xf32, #tpu.memory_space<vmem>>, vector<3x64xf32>
    %cst = arith.constant dense<0.000000e+00> : vector<128x64xf32>
    %2 = tpu.matmul %0, %1, %cst {dimension_numbers = #tpu.dot_dimension_numbers<[1], [0], [0], [1], [0, 0, 1, 1], [], []>} : vector<128x3xf32>, vector<3x64xf32>, vector<128x64xf32> -> vector<128x64xf32>
    %c0_3 = arith.constant 0 : index
    %c0_4 = arith.constant 0 : index
    %3 = vector.load %arg2[%c0_3, %c0_4] : memref<1x64xf32, #tpu.memory_space<vmem>>, vector<1x64xf32>
    %4 = vector.broadcast %3 : vector<1x64xf32> to vector<128x64xf32>
    %5 = arith.addf %2, %4 : vector<128x64xf32>
    %cst_5 = arith.constant 0.000000e+00 : f32
    %6 = vector.broadcast %cst_5 : f32 to vector<128x64xf32>
    %7 = arith.maximumf %5, %6 : vector<128x64xf32>
    %c0_6 = arith.constant 0 : index
    %c0_7 = arith.constant 0 : index
    %8 = vector.load %arg3[%c0_6, %c0_7] : memref<64x32xf32, #tpu.memory_space<vmem>>, vector<64x32xf32>
    %cst_8 = arith.constant dense<0.000000e+00> : vector<128x32xf32>
    %9 = tpu.matmul %7, %8, %cst_8 {dimension_numbers = #tpu.dot_dimension_numbers<[1], [0], [0], [1], [0, 0, 1, 1], [], []>} : vector<128x64xf32>, vector<64x32xf32>, vector<128x32xf32> -> vector<128x32xf32>
    %c0_9 = arith.constant 0 : index
    %c0_10 = arith.constant 0 : index
    %10 = vector.load %arg4[%c0_9, %c0_10] : memref<1x32xf32, #tpu.memory_space<vmem>>, vector<1x32xf32>
    %11 = vector.broadcast %10 : vector<1x32xf32> to vector<128x32xf32>
    %12 = arith.addf %9, %11 : vector<128x32xf32>
    %cst_11 = arith.constant 0.000000e+00 : f32
    %13 = vector.broadcast %cst_11 : f32 to vector<128x32xf32>
    %14 = arith.maximumf %12, %13 : vector<128x32xf32>
    %15 = vector.extract_strided_slice %12 {offsets = [0, 0], sizes = [64, 32], strides = [1, 1]} : vector<128x32xf32> to vector<64x32xf32>
    %cst_12 = arith.constant dense<0xFF800000> : vector<32xf32>
    %16 = vector.multi_reduction <maximumf>, %15, %cst_12 [0] : vector<64x32xf32> to vector<32xf32>
    %17 = vector.shape_cast %16 : vector<32xf32> to vector<1x32xf32>
    %18 = vector.extract_strided_slice %12 {offsets = [64, 0], sizes = [64, 32], strides = [1, 1]} : vector<128x32xf32> to vector<64x32xf32>
    %cst_13 = arith.constant dense<0xFF800000> : vector<32xf32>
    %19 = vector.multi_reduction <maximumf>, %18, %cst_13 [0] : vector<64x32xf32> to vector<32xf32>
    %20 = vector.shape_cast %19 : vector<32xf32> to vector<1x32xf32>
    %21 = tpu.concatenate %17, %20 in 0 : vector<1x32xf32>, vector<1x32xf32> -> vector<2x32xf32>
    %cst_14 = arith.constant 0.000000e+00 : f32
    %22 = vector.broadcast %cst_14 : f32 to vector<2x32xf32>
    %23 = arith.maximumf %21, %22 : vector<2x32xf32>
    %c32 = arith.constant 32 : index
    %c0_15 = arith.constant 0 : index
    %24 = vector.load %arg5[%c32, %c0_15] : memref<64x32xf32, #tpu.memory_space<vmem>>, vector<32x32xf32>
    %cst_16 = arith.constant dense<0.000000e+00> : vector<2x32xf32>
    %25 = tpu.matmul %23, %24, %cst_16 {dimension_numbers = #tpu.dot_dimension_numbers<[1], [0], [0], [1], [0, 0, 1, 1], [], []>} : vector<2x32xf32>, vector<32x32xf32>, vector<2x32xf32> -> vector<2x32xf32>
    %c0_17 = arith.constant 0 : index
    %c0_18 = arith.constant 0 : index
    %26 = vector.load %arg5[%c0_17, %c0_18] : memref<64x32xf32, #tpu.memory_space<vmem>>, vector<32x32xf32>
    %cst_19 = arith.constant dense<0.000000e+00> : vector<128x32xf32>
    %27 = tpu.matmul %14, %26, %cst_19 {dimension_numbers = #tpu.dot_dimension_numbers<[1], [0], [0], [1], [0, 0, 1, 1], [], []>} : vector<128x32xf32>, vector<32x32xf32>, vector<128x32xf32> -> vector<128x32xf32>
    %28 = vector.extract_strided_slice %27 {offsets = [0, 0], sizes = [64, 32], strides = [1, 1]} : vector<128x32xf32> to vector<64x32xf32>
    %29 = vector.extract_strided_slice %25 {offsets = [0, 0], sizes = [1, 32], strides = [1, 1]} : vector<2x32xf32> to vector<1x32xf32>
    %30 = vector.broadcast %29 : vector<1x32xf32> to vector<64x32xf32>
    %31 = arith.addf %28, %30 : vector<64x32xf32>
    %32 = vector.extract_strided_slice %27 {offsets = [64, 0], sizes = [64, 32], strides = [1, 1]} : vector<128x32xf32> to vector<64x32xf32>
    %33 = vector.extract_strided_slice %25 {offsets = [1, 0], sizes = [1, 32], strides = [1, 1]} : vector<2x32xf32> to vector<1x32xf32>
    %34 = vector.broadcast %33 : vector<1x32xf32> to vector<64x32xf32>
    %35 = arith.addf %32, %34 : vector<64x32xf32>
    %36 = tpu.concatenate %31, %35 in 0 : vector<64x32xf32>, vector<64x32xf32> -> vector<128x32xf32>
    %c0_20 = arith.constant 0 : index
    %c0_21 = arith.constant 0 : index
    %37 = vector.load %arg6[%c0_20, %c0_21] : memref<1x32xf32, #tpu.memory_space<vmem>>, vector<1x32xf32>
    %38 = vector.broadcast %37 : vector<1x32xf32> to vector<128x32xf32>
    %39 = arith.addf %36, %38 : vector<128x32xf32>
    %cst_22 = arith.constant 0.000000e+00 : f32
    %40 = vector.broadcast %cst_22 : f32 to vector<128x32xf32>
    %41 = arith.maximumf %39, %40 : vector<128x32xf32>
    %42 = vector.extract_strided_slice %39 {offsets = [0, 0], sizes = [64, 32], strides = [1, 1]} : vector<128x32xf32> to vector<64x32xf32>
    %cst_23 = arith.constant dense<0xFF800000> : vector<32xf32>
    %43 = vector.multi_reduction <maximumf>, %42, %cst_23 [0] : vector<64x32xf32> to vector<32xf32>
    %44 = vector.shape_cast %43 : vector<32xf32> to vector<1x32xf32>
    %45 = vector.extract_strided_slice %39 {offsets = [64, 0], sizes = [64, 32], strides = [1, 1]} : vector<128x32xf32> to vector<64x32xf32>
    %cst_24 = arith.constant dense<0xFF800000> : vector<32xf32>
    %46 = vector.multi_reduction <maximumf>, %45, %cst_24 [0] : vector<64x32xf32> to vector<32xf32>
    %47 = vector.shape_cast %46 : vector<32xf32> to vector<1x32xf32>
    %48 = tpu.concatenate %44, %47 in 0 : vector<1x32xf32>, vector<1x32xf32> -> vector<2x32xf32>
    %cst_25 = arith.constant 0.000000e+00 : f32
    %49 = vector.broadcast %cst_25 : f32 to vector<2x32xf32>
    %50 = arith.maximumf %48, %49 : vector<2x32xf32>
    %c64 = arith.constant 64 : index
    %c0_26 = arith.constant 0 : index
    %51 = vector.load %arg7[%c64, %c0_26] : memref<96x32xf32, #tpu.memory_space<vmem>>, vector<32x32xf32>
    %cst_27 = arith.constant dense<0.000000e+00> : vector<2x32xf32>
    %52 = tpu.matmul %50, %51, %cst_27 {dimension_numbers = #tpu.dot_dimension_numbers<[1], [0], [0], [1], [0, 0, 1, 1], [], []>} : vector<2x32xf32>, vector<32x32xf32>, vector<2x32xf32> -> vector<2x32xf32>
    %c0_28 = arith.constant 0 : index
    %c0_29 = arith.constant 0 : index
    %53 = vector.load %arg7[%c0_28, %c0_29] : memref<96x32xf32, #tpu.memory_space<vmem>>, vector<32x32xf32>
    %cst_30 = arith.constant dense<0.000000e+00> : vector<128x32xf32>
    %54 = tpu.matmul %14, %53, %cst_30 {dimension_numbers = #tpu.dot_dimension_numbers<[1], [0], [0], [1], [0, 0, 1, 1], [], []>} : vector<128x32xf32>, vector<32x32xf32>, vector<128x32xf32> -> vector<128x32xf32>
    %c32_31 = arith.constant 32 : index
    %c0_32 = arith.constant 0 : index
    %55 = vector.load %arg7[%c32_31, %c0_32] : memref<96x32xf32, #tpu.memory_space<vmem>>, vector<32x32xf32>
    %cst_33 = arith.constant dense<0.000000e+00> : vector<128x32xf32>
    %56 = tpu.matmul %41, %55, %cst_33 {dimension_numbers = #tpu.dot_dimension_numbers<[1], [0], [0], [1], [0, 0, 1, 1], [], []>} : vector<128x32xf32>, vector<32x32xf32>, vector<128x32xf32> -> vector<128x32xf32>
    %57 = arith.addf %54, %56 : vector<128x32xf32>
    %58 = vector.extract_strided_slice %57 {offsets = [0, 0], sizes = [64, 32], strides = [1, 1]} : vector<128x32xf32> to vector<64x32xf32>
    %59 = vector.extract_strided_slice %52 {offsets = [0, 0], sizes = [1, 32], strides = [1, 1]} : vector<2x32xf32> to vector<1x32xf32>
    %60 = vector.broadcast %59 : vector<1x32xf32> to vector<64x32xf32>
    %61 = arith.addf %58, %60 : vector<64x32xf32>
    %62 = vector.extract_strided_slice %57 {offsets = [64, 0], sizes = [64, 32], strides = [1, 1]} : vector<128x32xf32> to vector<64x32xf32>
    %63 = vector.extract_strided_slice %52 {offsets = [1, 0], sizes = [1, 32], strides = [1, 1]} : vector<2x32xf32> to vector<1x32xf32>
    %64 = vector.broadcast %63 : vector<1x32xf32> to vector<64x32xf32>
    %65 = arith.addf %62, %64 : vector<64x32xf32>
    %66 = tpu.concatenate %61, %65 in 0 : vector<64x32xf32>, vector<64x32xf32> -> vector<128x32xf32>
    %c0_34 = arith.constant 0 : index
    %c0_35 = arith.constant 0 : index
    %67 = vector.load %arg8[%c0_34, %c0_35] : memref<1x32xf32, #tpu.memory_space<vmem>>, vector<1x32xf32>
    %68 = vector.broadcast %67 : vector<1x32xf32> to vector<128x32xf32>
    %69 = arith.addf %66, %68 : vector<128x32xf32>
    %cst_36 = arith.constant 0.000000e+00 : f32
    %70 = vector.broadcast %cst_36 : f32 to vector<128x32xf32>
    %71 = arith.maximumf %69, %70 : vector<128x32xf32>
    %72 = vector.extract_strided_slice %69 {offsets = [0, 0], sizes = [64, 32], strides = [1, 1]} : vector<128x32xf32> to vector<64x32xf32>
    %cst_37 = arith.constant dense<0xFF800000> : vector<32xf32>
    %73 = vector.multi_reduction <maximumf>, %72, %cst_37 [0] : vector<64x32xf32> to vector<32xf32>
    %74 = vector.shape_cast %73 : vector<32xf32> to vector<1x32xf32>
    %75 = vector.extract_strided_slice %69 {offsets = [64, 0], sizes = [64, 32], strides = [1, 1]} : vector<128x32xf32> to vector<64x32xf32>
    %cst_38 = arith.constant dense<0xFF800000> : vector<32xf32>
    %76 = vector.multi_reduction <maximumf>, %75, %cst_38 [0] : vector<64x32xf32> to vector<32xf32>
    %77 = vector.shape_cast %76 : vector<32xf32> to vector<1x32xf32>
    %78 = tpu.concatenate %74, %77 in 0 : vector<1x32xf32>, vector<1x32xf32> -> vector<2x32xf32>
    %cst_39 = arith.constant 0.000000e+00 : f32
    %79 = vector.broadcast %cst_39 : f32 to vector<2x32xf32>
    %80 = arith.maximumf %78, %79 : vector<2x32xf32>
    %c96 = arith.constant 96 : index
    %c0_40 = arith.constant 0 : index
    %81 = vector.load %arg9[%c96, %c0_40] : memref<128x32xf32, #tpu.memory_space<vmem>>, vector<32x32xf32>
    %cst_41 = arith.constant dense<0.000000e+00> : vector<2x32xf32>
    %82 = tpu.matmul %80, %81, %cst_41 {dimension_numbers = #tpu.dot_dimension_numbers<[1], [0], [0], [1], [0, 0, 1, 1], [], []>} : vector<2x32xf32>, vector<32x32xf32>, vector<2x32xf32> -> vector<2x32xf32>
    %c0_42 = arith.constant 0 : index
    %c0_43 = arith.constant 0 : index
    %83 = vector.load %arg9[%c0_42, %c0_43] : memref<128x32xf32, #tpu.memory_space<vmem>>, vector<32x32xf32>
    %cst_44 = arith.constant dense<0.000000e+00> : vector<128x32xf32>
    %84 = tpu.matmul %14, %83, %cst_44 {dimension_numbers = #tpu.dot_dimension_numbers<[1], [0], [0], [1], [0, 0, 1, 1], [], []>} : vector<128x32xf32>, vector<32x32xf32>, vector<128x32xf32> -> vector<128x32xf32>
    %c32_45 = arith.constant 32 : index
    %c0_46 = arith.constant 0 : index
    %85 = vector.load %arg9[%c32_45, %c0_46] : memref<128x32xf32, #tpu.memory_space<vmem>>, vector<32x32xf32>
    %cst_47 = arith.constant dense<0.000000e+00> : vector<128x32xf32>
    %86 = tpu.matmul %41, %85, %cst_47 {dimension_numbers = #tpu.dot_dimension_numbers<[1], [0], [0], [1], [0, 0, 1, 1], [], []>} : vector<128x32xf32>, vector<32x32xf32>, vector<128x32xf32> -> vector<128x32xf32>
    %87 = arith.addf %84, %86 : vector<128x32xf32>
    %c64_48 = arith.constant 64 : index
    %c0_49 = arith.constant 0 : index
    %88 = vector.load %arg9[%c64_48, %c0_49] : memref<128x32xf32, #tpu.memory_space<vmem>>, vector<32x32xf32>
    %cst_50 = arith.constant dense<0.000000e+00> : vector<128x32xf32>
    %89 = tpu.matmul %71, %88, %cst_50 {dimension_numbers = #tpu.dot_dimension_numbers<[1], [0], [0], [1], [0, 0, 1, 1], [], []>} : vector<128x32xf32>, vector<32x32xf32>, vector<128x32xf32> -> vector<128x32xf32>
    %90 = arith.addf %87, %89 : vector<128x32xf32>
    %91 = vector.extract_strided_slice %90 {offsets = [0, 0], sizes = [64, 32], strides = [1, 1]} : vector<128x32xf32> to vector<64x32xf32>
    %92 = vector.extract_strided_slice %82 {offsets = [0, 0], sizes = [1, 32], strides = [1, 1]} : vector<2x32xf32> to vector<1x32xf32>
    %93 = vector.broadcast %92 : vector<1x32xf32> to vector<64x32xf32>
    %94 = arith.addf %91, %93 : vector<64x32xf32>
    %95 = vector.extract_strided_slice %90 {offsets = [64, 0], sizes = [64, 32], strides = [1, 1]} : vector<128x32xf32> to vector<64x32xf32>
    %96 = vector.extract_strided_slice %82 {offsets = [1, 0], sizes = [1, 32], strides = [1, 1]} : vector<2x32xf32> to vector<1x32xf32>
    %97 = vector.broadcast %96 : vector<1x32xf32> to vector<64x32xf32>
    %98 = arith.addf %95, %97 : vector<64x32xf32>
    %99 = tpu.concatenate %94, %98 in 0 : vector<64x32xf32>, vector<64x32xf32> -> vector<128x32xf32>
    %c0_51 = arith.constant 0 : index
    %c0_52 = arith.constant 0 : index
    %100 = vector.load %arg10[%c0_51, %c0_52] : memref<1x32xf32, #tpu.memory_space<vmem>>, vector<1x32xf32>
    %101 = vector.broadcast %100 : vector<1x32xf32> to vector<128x32xf32>
    %102 = arith.addf %99, %101 : vector<128x32xf32>
    %103 = vector.extract_strided_slice %102 {offsets = [0, 0], sizes = [64, 32], strides = [1, 1]} : vector<128x32xf32> to vector<64x32xf32>
    %cst_53 = arith.constant dense<0xFF800000> : vector<32xf32>
    %104 = vector.multi_reduction <maximumf>, %103, %cst_53 [0] : vector<64x32xf32> to vector<32xf32>
    %105 = vector.shape_cast %104 : vector<32xf32> to vector<1x32xf32>
    %106 = vector.extract_strided_slice %102 {offsets = [64, 0], sizes = [64, 32], strides = [1, 1]} : vector<128x32xf32> to vector<64x32xf32>
    %cst_54 = arith.constant dense<0xFF800000> : vector<32xf32>
    %107 = vector.multi_reduction <maximumf>, %106, %cst_54 [0] : vector<64x32xf32> to vector<32xf32>
    %108 = vector.shape_cast %107 : vector<32xf32> to vector<1x32xf32>
    %109 = tpu.concatenate %105, %108 in 0 : vector<1x32xf32>, vector<1x32xf32> -> vector<2x32xf32>
    %cst_55 = arith.constant 0.000000e+00 : f32
    %110 = vector.broadcast %cst_55 : f32 to vector<2x32xf32>
    %111 = arith.maximumf %109, %110 : vector<2x32xf32>
    %c0_56 = arith.constant 0 : index
    %c0_57 = arith.constant 0 : index
    %112 = vector.load %arg11[%c0_56, %c0_57] : memref<32x32xf32, #tpu.memory_space<vmem>>, vector<32x32xf32>
    %cst_58 = arith.constant dense<0.000000e+00> : vector<2x32xf32>
    %113 = tpu.matmul %111, %112, %cst_58 {dimension_numbers = #tpu.dot_dimension_numbers<[1], [0], [0], [1], [0, 0, 1, 1], [], []>} : vector<2x32xf32>, vector<32x32xf32>, vector<2x32xf32> -> vector<2x32xf32>
    %c0_59 = arith.constant 0 : index
    %c0_60 = arith.constant 0 : index
    %114 = vector.load %arg12[%c0_59, %c0_60] : memref<1x32xf32, #tpu.memory_space<vmem>>, vector<1x32xf32>
    %115 = vector.broadcast %114 : vector<1x32xf32> to vector<2x32xf32>
    %116 = arith.addf %113, %115 : vector<2x32xf32>
    %c0_61 = arith.constant 0 : index
    %c0_62 = arith.constant 0 : index
    %117 = vector.load %arg13[%c0_61, %c0_62] : memref<2x32xf32, #tpu.memory_space<vmem>>, vector<2x32xf32>
    tpu.vector_store %arg13[%c0_61, %c0_62], %116 {strides = array<i32>} : memref<2x32xf32, #tpu.memory_space<vmem>>, vector<2x32xf32>,
    return
  }
}

</mosaic_0001>

<bundles_post_ra>
// kernel: tpu_custom_call.1
= control target key start
LH: loop header
LB: loop body
LE: loop exit
PB: predicated region body
PF: predicated region fallthrough
CT: control target
= control target key end

     0   :  { %vm118_vm0 = vcmask 1042432   ;;  %vm69_vm1 = vcmask 23552   ;;  %s3889_s0 = inlined_call_operand.vmem [shape: f32[128,3], index: 0, kind: input, shape index: {}]   ;;  %s3890_s1 = inlined_call_operand.vmem [shape: f32[3,64], index: 1, kind: input, shape index: {}]   ;;  %s3891_s2 = inlined_call_operand.vmem [shape: f32[1,64], index: 2, kind: input, shape index: {}]   ;;  %s3892_s3 = inlined_call_operand.vmem [shape: f32[64,32], index: 3, kind: input, shape index: {}]   ;;  %s3893_s4 = inlined_call_operand.vmem [shape: f32[1,32], index: 4, kind: input, shape index: {}]   ;;  %s3894_s5 = inlined_call_operand.vmem [shape: f32[64,32], index: 5, kind: input, shape index: {}]   ;;  %s3895_s6 = inlined_call_operand.vmem [shape: f32[1,32], index: 6, kind: input, shape index: {}]   ;;  %s3896_s7 = inlined_call_operand.vmem [shape: f32[96,32], index: 7, kind: input, shape index: {}]   ;;  %s3897_s8 = inlined_call_operand.vmem [shape: f32[1,32], index: 8, kind: input, shape index: {}]   ;;  %s3898_s9 = inlined_call_operand.vmem [shape: f32[128,32], index: 9, kind: input, shape index: {}]   ;;  %s3899_s10 = inlined_call_operand.vmem [shape: f32[1,32], index: 10, kind: input, shape index: {}]   ;;  %s3900_s11 = inlined_call_operand.vmem [shape: f32[32,32], index: 11, kind: input, shape index: {}]   ;;  %s3901_s12 = inlined_call_operand.vmem [shape: f32[1,32], index: 12, kind: input, shape index: {}]   ;;  %s3902_s13 = inlined_call_operand.hbm [shape: f32[2,32], index: 13, kind: output, shape index: {}]  }
   0x1   :  { %v61_v0 = vld [vmem:[%s3890_s1] sm:$0x7]  ;;  %v46_v2 = vld [vmem:[%s3889_s0 + $0x8] sm:$0xff]  ;;  %v47_v3 = vld [vmem:[%s3889_s0 + $0x10] sm:$0xff] }
   0x2   :  { %v45_v1 = vld [vmem:[%s3889_s0] sm:$0xff]  ;;  %2564 = vmatprep.subr.msk.mxu1 %vm118_vm0, %v61_v0  ;;  %v48_v4 = vld [vmem:[%s3889_s0 + $0x18] sm:$0xff]  ;;  %v284_v7 = vld [vmem:[%s3892_s3 + $0x8] sm:$0xff] }
   0x3   :  { %2566 = vmatprep.mubr.msk.f32.mxu1 %vm69_vm1, %v45_v1  ;;  %2565 = vmatpush3.msk.msra.mxu1 %vm118_vm0, %v61_v0  ;;  %v49_v5 = vld [vmem:[%s3889_s0 + $0x20] sm:$0xff]  ;;  %v285_v8 = vld [vmem:[%s3892_s3 + $0x10] sm:$0xff]  ;;  %v286_v9 = vld [vmem:[%s3892_s3 + $0x18] sm:$0xff] }
   0x4   :  { %2567 = vmatmul.mubr.msk.f32.vlgmr.msra.gmra.mrb[0].mxu1 %vm69_vm1, %v46_v2  ;;  %v283_v6 = vld [vmem:[%s3892_s3] sm:$0xff]  ;;  %v50_v10 = vld [vmem:[%s3889_s0 + $0x28] sm:$0xff]  ;;  %v2870_v12 = vpack.c.bf16 %v286_v9, %v285_v8 }
   0x5   :  { %2569 = vmatprep.mubr.msk.f32.mxu1 %vm69_vm1, %v47_v3  ;;  %v2866_v11 = vpack.c.bf16 %v284_v7, %v283_v6  ;;  %v287_v13 = vld [vmem:[%s3892_s3 + $0x20] sm:$0xff]  ;;  %v288_v14 = vld [vmem:[%s3892_s3 + $0x28] sm:$0xff] }
   0x8   :  { %2570 = vmatmul.mubr.msk.f32.gmra.mrb[2].mxu1 %vm69_vm1, %v48_v4 }
   0x9   :  { %2572 = vmatprep.mubr.msk.f32.mxu1 %vm69_vm1, %v49_v5 }
   0xa   :  { %18 = vsyncpa [#allocation3], 0  ;;  %v51_v15 = vld [vmem:[%s3889_s0 + $0x30] sm:$0xff]  ;;  %2867 = vmatprep.subr.bf16.mxu1 %v2866_v11  ;;  %v2874_v16 = vpack.c.bf16 %v288_v14, %v287_v13  ;;  %v52_v17 = vld [vmem:[%s3889_s0 + $0x38] sm:$0xff]  ;;  %vm298_vm2 = vcmask 523264   ;;  %vm3031_vm3 = vmmov 0  }
   0xb   :  { %2869 = vmatpush3.bf16.msra.mxu1 %v2866_v11  ;;  %v289_v18 = vld [vmem:[%s3892_s3 + $0x30] sm:$0xff]  ;;  %v290_v19 = vld [vmem:[%s3892_s3 + $0x38] sm:$0xff]  ;;  %v53_v20 = vld [vmem:[%s3889_s0 + $0x40] sm:$0xff]  ;;  %vm508_vm4 = vcmask 261120   ;;  %vm551_vm5 = vcmask 1040384   ;;  %s3033_s30 = smov [#allocation2]  }
   0xc   :  { %2573 = vmatmul.mubr.msk.f32.gmra.mrb[4].mxu1 %vm69_vm1, %v50_v10  ;;  %2871 = vmatprep.subr.bf16.mxu1 %v2870_v12  ;;  %v2878_v21 = vpack.c.bf16 %v290_v19, %v289_v18  ;;  %v54_v22 = vld [vmem:[%s3889_s0 + $0x48] sm:$0xff]  ;;  %v55_v23 = vld [vmem:[%s3889_s0 + $0x50] sm:$0xff]  ;;  %v56_v24 = vld [vmem:[%s3889_s0 + $0x58] sm:$0xff]  ;;  %s2236_s14 = sshll.u32 %s3033_s30, 4  ;;  %vm2228_vm6 = vcmask 254976   ;;  %s2237_s14 = int_to_ptr.vmem [resolvable:$true] %s2236_s14 }
   0xd   :  { %2575 = vmatprep.mubr.msk.f32.mxu1 %vm69_vm1, %v51_v15  ;;  %v57_v25 = vld [vmem:[%s3889_s0 + $0x60] sm:$0xff]  ;;  %v58_v26 = vld [vmem:[%s3889_s0 + $0x68] sm:$0xff]  ;;  %v59_v27 = vld [vmem:[%s3889_s0 + $0x70] sm:$0xff]  ;;  %s3006_s15 = scalar_lea.vmem %s2237_s14, 32  ;;  %p3011_p1 = scmp.lt.s32.totalorder %s2237_s14, %s2237_s14 }
   0xe   :  { %v60_v28 = vld [vmem:[%s3889_s0 + $0x78] sm:$0xff]  ;;  %v631_v29 = vld [vmem:[%s3894_s5] sm:$0xff]  ;;  %v632_v30 = vld [vmem:[%s3894_s5 + $0x8] sm:$0xff]  ;;  %p3007_p0 = scmp.ne.s32.totalorder %s2237_s14, %s3006_s15  ;;  %p3012_p2 = scmp.lt.s32.totalorder %s3006_s15, %s3006_s15 }
   0xf   :  { %2873 = vmatpush3.bf16.msra.mxu1 %v2870_v12  ;;  %v2888_v31 = vpack.c.bf16 %v632_v30, %v631_v29  ;;  %v2244_v32 = vld [vmem:[%s3891_s2] ss:$0 sm:$0xff]  ;;  %v634_v18 = vld [vmem:[%s3894_s5 + $0x18] sm:$0xff] }
  0x10   :  { %2576 = vmatmul.mubr.msk.f32.gmra.mrb[6].mxu1 %vm69_vm1, %v52_v17  ;;  %2875 = vmatprep.subr.bf16.mxu1 %v2874_v16  ;;  %v633_v17 = vld [vmem:[%s3894_s5 + $0x10] sm:$0xff]  ;;  %p3013_p3 = por %p3012_p2, %p3011_p1 }
  0x11   :  { %2578 = vmatprep.mubr.msk.f32.mxu1 %vm69_vm1, %v53_v20  ;;  %2889 = vmatprep.subr.bf16.mxu0 %v2888_v31  ;;  %v2892_v19 = vpack.c.bf16 %v634_v18, %v633_v17  ;;  %v554_v20 = vld [vmem:[%s3894_s5 + $0x20] sm:$0xff] }
  0x12   :  { %2891 = vmatpush3.bf16.msra.mxu0 %v2888_v31  ;;  %p3014_p4 = pnand %p3013_p3, %p3007_p0 }
  0x13   :  { %2877 = vmatpush3.bf16.msra.mxu1 %v2874_v16  ;;  %2893 = vmatprep.subr.bf16.mxu0 %v2892_v19 }
  0x14   :  { %2579 = vmatmul.mubr.msk.f32.gmra.mrb[8].mxu1 %vm69_vm1, %v54_v22  ;;  %2879 = vmatprep.subr.bf16.mxu1 %v2878_v21  ;;  %v3904_v22 = vmov 0.0|0.0  }
  0x15   :  { %2581 = vmatprep.mubr.msk.f32.mxu1 %vm69_vm1, %v55_v23 }
  0x16   :  { %2895 = vmatpush3.bf16.msra.mxu0 %v2892_v19 }
  0x17   :  { %2881 = vmatpush3.bf16.msra.mxu1 %v2878_v21  ;;  %v555_v21 = vld [vmem:[%s3894_s5 + $0x28] sm:$0xff]  ;;  %2918 = vmatprep.subr.bf16.mxu0 %v3904_v22 }
  0x18   :  { %2582 = vmatmul.mubr.msk.f32.gmra.mrb[10].mxu1 %vm69_vm1, %v56_v24  ;;  %2882 = vmatprep.subr.bf16.mxu1 %v3904_v22  ;;  %v2883_v23 = vpack.c.bf16 %v555_v21, %v554_v20  ;;  %v556_v24 = vld [vmem:[%s3894_s5 + $0x30] sm:$0xff] }
  0x19   :  { %2584 = vmatprep.mubr.msk.f32.mxu1 %vm69_vm1, %v57_v25  ;;  %v557_v25 = vld [vmem:[%s3894_s5 + $0x38] sm:$0xff] }
  0x1c   :  { %2585 = vmatmul.mubr.msk.f32.gmra.mrb[12].mxu1 %vm69_vm1, %v58_v26  ;;  %v2886_v26 = vpack.c.bf16 %v557_v25, %v556_v24 }
  0x1d   :  { %2587 = vmatprep.mubr.msk.f32.mxu1 %vm69_vm1, %v59_v27  ;;  %v3903_v27 = vmov 0.0  }
  0x20   :  { %2588 = vmatmul.mubr.msk.f32.gmra.mrb[14].mxu1 %vm69_vm1, %v60_v28  ;;  %v3247_v28 = vld [vmem:[%s3893_s4] ss:$0 sm:$0xff] }
  0xd7   :  { %v2568_v33 = vpop.f32.mrb[0].mxu1 }
  0xd8   :  { %v194_v34 = vadd.f32 %v2568_v33, %v2244_v32  ;;  %v188_v35 = vpop.f32.mrb[1].mxu1 }
  0xd9   :  { %v189_v36 = vadd.f32 %v2244_v32, %v188_v35 }
  0xda   :  { %v268_v39 = vmax.f32 %v194_v34, 0.0 }
  0xdb   :  { %v267_v37 = vmax.f32 %v189_v36, 0.0  ;;  %v2571_v38 = vpop.f32.mrb[2].mxu1 }
  0xdc   :  { %v204_v40 = vadd.f32 %v2571_v38, %v2244_v32  ;;  %v198_v41 = vpop.f32.mrb[3].mxu1 }
  0xdd   :  { %v199_v42 = vadd.f32 %v2244_v32, %v198_v41  ;;  %2606 = vmatprep.mubr.msk.f32.mxu1 %vm298_vm2, %v267_v37 }
  0xde   :  { %2607 = vmatmul.mubr.msk.f32.vlgmr.msra.gmra.mrb[16].mxu1 %vm298_vm2, %v268_v39  ;;  %v270_v45 = vmax.f32 %v204_v40, 0.0 }
  0xdf   :  { %v269_v43 = vmax.f32 %v199_v42, 0.0  ;;  %v2574_v44 = vpop.f32.mrb[4].mxu1  ;;  %2884 = vmatpush3.bf16.msra.mxu1 %v2883_v23 }
  0xe0   :  { %v214_v46 = vadd.f32 %v2574_v44, %v2244_v32  ;;  %v208_v47 = vpop.f32.mrb[5].mxu1  ;;  %2885 = vmatprep.subr.bf16.mxu1 %v3904_v22 }
  0xe1   :  { %v209_v48 = vadd.f32 %v2244_v32, %v208_v47  ;;  %2609 = vmatprep.mubr.msk.f32.mxu1 %vm298_vm2, %v269_v43 }
  0xe2   :  { %2610 = vmatmul.mubr.msk.f32.gmra.mrb[18].mxu1 %vm298_vm2, %v270_v45  ;;  %v272_v51 = vmax.f32 %v214_v46, 0.0 }
  0xe3   :  { %v271_v49 = vmax.f32 %v209_v48, 0.0  ;;  %v2577_v50 = vpop.f32.mrb[6].mxu1  ;;  %2887 = vmatpush3.bf16.msra.mxu1 %v2886_v26 }
  0xe4   :  { %v224_v52 = vadd.f32 %v2577_v50, %v2244_v32  ;;  %v218_v53 = vpop.f32.mrb[7].mxu1  ;;  %2896 = vmatprep.subr.bf16.mxu1 %v3904_v22 }
  0xe5   :  { %v219_v54 = vadd.f32 %v2244_v32, %v218_v53  ;;  %2612 = vmatprep.mubr.msk.f32.mxu1 %vm298_vm2, %v271_v49 }
  0xe6   :  { %2613 = vmatmul.mubr.msk.f32.gmra.mrb[20].mxu1 %vm298_vm2, %v272_v51  ;;  %v274_v57 = vmax.f32 %v224_v52, 0.0 }
  0xe7   :  { %v273_v55 = vmax.f32 %v219_v54, 0.0  ;;  %v2580_v56 = vpop.f32.mrb[8].mxu1 }
  0xe8   :  { %v234_v58 = vadd.f32 %v2580_v56, %v2244_v32  ;;  %v228_v59 = vpop.f32.mrb[9].mxu1 }
  0xe9   :  { %v229_v60 = vadd.f32 %v2244_v32, %v228_v59  ;;  %2615 = vmatprep.mubr.msk.f32.mxu1 %vm298_vm2, %v273_v55 }
  0xea   :  { %2616 = vmatmul.mubr.msk.f32.gmra.mrb[22].mxu1 %vm298_vm2, %v274_v57  ;;  %v276_v63 = vmax.f32 %v234_v58, 0.0 }
  0xeb   :  { %v275_v61 = vmax.f32 %v229_v60, 0.0  ;;  %v2583_v62 = vpop.f32.mrb[10].mxu1 }
  0xec   :  { %v244_v0 = vadd.f32 %v2583_v62, %v2244_v32  ;;  %v238_v1 = vpop.f32.mrb[11].mxu1 }
  0xed   :  { %v239_v2 = vadd.f32 %v2244_v32, %v238_v1  ;;  %2618 = vmatprep.mubr.msk.f32.mxu1 %vm298_vm2, %v275_v61 }
  0xee   :  { %2619 = vmatmul.mubr.msk.f32.gmra.mrb[24].mxu1 %vm298_vm2, %v276_v63  ;;  %v278_v5 = vmax.f32 %v244_v0, 0.0 }
  0xef   :  { %v277_v3 = vmax.f32 %v239_v2, 0.0  ;;  %v2586_v4 = vpop.f32.mrb[12].mxu1 }
  0xf0   :  { %v254_v6 = vadd.f32 %v2586_v4, %v2244_v32  ;;  %v248_v7 = vpop.f32.mrb[13].mxu1 }
  0xf1   :  { %v249_v8 = vadd.f32 %v2244_v32, %v248_v7  ;;  %2621 = vmatprep.mubr.msk.f32.mxu1 %vm298_vm2, %v277_v3 }
  0xf2   :  { %2622 = vmatmul.mubr.msk.f32.gmra.mrb[26].mxu1 %vm298_vm2, %v278_v5  ;;  %v280_v11 = vmax.f32 %v254_v6, 0.0 }
  0xf3   :  { %v279_v9 = vmax.f32 %v249_v8, 0.0  ;;  %v2589_v10 = vpop.f32.mrb[14].mxu1 }
  0xf4   :  { %v264_v12 = vadd.f32 %v2589_v10, %v2244_v32  ;;  %v258_v13 = vpop.f32.mrb[15].mxu1 }
  0xf5   :  { %v259_v14 = vadd.f32 %v2244_v32, %v258_v13  ;;  %2624 = vmatprep.mubr.msk.f32.mxu1 %vm298_vm2, %v279_v9 }
  0xf6   :  { %2625 = vmatmul.mubr.msk.f32.gmra.mrb[28].mxu1 %vm298_vm2, %v280_v11  ;;  %v282_v16 = vmax.f32 %v264_v12, 0.0 }
  0xf7   :  { %v281_v15 = vmax.f32 %v259_v14, 0.0 }
  0xf9   :  { %2627 = vmatprep.mubr.msk.f32.mxu1 %vm298_vm2, %v281_v15 }
  0xfa   :  { %2628 = vmatmul.mubr.msk.f32.gmra.mrb[30].mxu1 %vm298_vm2, %v282_v16 }
  0xfb   :  { %2638 = vmatprep.mubr.msk.f32.mxu1 %vm3031_vm3, %v3903_v27 }
 0x1b1   :  { %v2608_v29 = vpop.f32.mrb[16].mxu1 }
 0x1b2   :  { %v419_v30 = vadd.f32 %v2608_v29, %v3247_v28  ;;  %v413_v31 = vpop.f32.mrb[17].mxu1 }
 0x1b3   :  { %v414_v32 = vadd.f32 %v3247_v28, %v413_v31 }
 0x1b4   :  { %v3253_v35 = vmax.f32 %v419_v30, 0.0  ;;  %v510_v45 = vsel %vm508_vm4, %v419_v30, -inf }
 0x1b5   :  { %v3251_v33 = vmax.f32 %v414_v32, 0.0  ;;  %v2611_v34 = vpop.f32.mrb[18].mxu1  ;;  %v509_v47 = vsel %vm508_vm4, %v414_v32, -inf }
 0x1b6   :  { %v429_v36 = vadd.f32 %v2611_v34, %v3247_v28  ;;  %v423_v37 = vpop.f32.mrb[19].mxu1 }
 0x1b7   :  { %v424_v38 = vadd.f32 %v3247_v28, %v423_v37  ;;  %2649 = vmatprep.mubr.msk.f32.mxu0 %vm508_vm4, %v3251_v33 }
 0x1b8   :  { %2650 = vmatmul.mubr.msk.f32.vlgmr.msra.gmra.mrb[0].mxu0 %vm508_vm4, %v3253_v35  ;;  %v3263_v41 = vmax.f32 %v429_v36, 0.0  ;;  %v512_v57 = vsel %vm508_vm4, %v429_v36, -inf }
 0x1b9   :  { %v3261_v39 = vmax.f32 %v424_v38, 0.0  ;;  %v2614_v40 = vpop.f32.mrb[20].mxu1  ;;  %v511_v60 = vsel %vm508_vm4, %v424_v38, -inf }
 0x1ba   :  { %v439_v42 = vadd.f32 %v2614_v40, %v3247_v28  ;;  %v433_v43 = vpop.f32.mrb[21].mxu1 }
 0x1bb   :  { %v434_v44 = vadd.f32 %v3247_v28, %v433_v43  ;;  %2652 = vmatprep.mubr.msk.f32.mxu0 %vm508_vm4, %v3261_v39 }
 0x1bc   :  { %v515_v46 = vsel %vm508_vm4, %v439_v42, -inf  ;;  %2653 = vmatmul.mubr.msk.f32.gmra.mrb[2].mxu0 %vm508_vm4, %v3263_v41  ;;  %v3277_v52 = vmax.f32 %v439_v42, 0.0 }
 0x1bd   :  { %v516_v48 = vmax.f32 %v510_v45, %v515_v46  ;;  %v3274_v49 = vmax.f32 %v434_v44, 0.0  ;;  %v513_v50 = vsel %vm508_vm4, %v434_v44, -inf  ;;  %v2617_v51 = vpop.f32.mrb[22].mxu1 }
 0x1be   :  { %v514_v53 = vmax.f32 %v509_v47, %v513_v50  ;;  %v449_v54 = vadd.f32 %v2617_v51, %v3247_v28  ;;  %v443_v55 = vpop.f32.mrb[23].mxu1 }
 0x1bf   :  { %v444_v56 = vadd.f32 %v3247_v28, %v443_v55  ;;  %2655 = vmatprep.mubr.msk.f32.mxu0 %vm508_vm4, %v3274_v49 }
 0x1c0   :  { %v521_v58 = vmax.f32 %v514_v53, %v516_v48  ;;  %v519_v59 = vsel %vm508_vm4, %v449_v54, -inf  ;;  %2656 = vmatmul.mubr.msk.f32.gmra.mrb[4].mxu0 %vm508_vm4, %v3277_v52  ;;  %v3291_v1 = vmax.f32 %v449_v54, 0.0 }
 0x1c1   :  { %v520_v61 = vmax.f32 %v512_v57, %v519_v59  ;;  %v3288_v62 = vmax.f32 %v444_v56, 0.0  ;;  %v517_v63 = vsel %vm508_vm4, %v444_v56, -inf  ;;  %v2620_v0 = vpop.f32.mrb[24].mxu1 }
 0x1c2   :  { %v518_v2 = vmax.f32 %v511_v60, %v517_v63  ;;  %v459_v3 = vadd.f32 %v2620_v0, %v3247_v28  ;;  %v453_v4 = vpop.f32.mrb[25].mxu1 }
 0x1c3   :  { %v454_v5 = vadd.f32 %v3247_v28, %v453_v4  ;;  %2658 = vmatprep.mubr.msk.f32.mxu0 %vm508_vm4, %v3288_v62  ;;  %v936_v4 = vld [vmem:[%s3896_s7 + $0x48] sm:$0xff] }
 0x1c4   :  { %v522_v6 = vmax.f32 %v518_v2, %v520_v61  ;;  %2659 = vmatmul.mubr.msk.f32.gmra.mrb[6].mxu0 %vm508_vm4, %v3291_v1  ;;  %v3301_v10 = vmax.f32 %v459_v3, 0.0  ;;  %v531_v20 = vsel %vm508_vm4, %v459_v3, -inf  ;;  %v935_v3 = vld [vmem:[%s3896_s7 + $0x40] sm:$0xff] }
 0x1c5   :  { %v3299_v7 = vmax.f32 %v454_v5, 0.0  ;;  %v2623_v8 = vpop.f32.mrb[26].mxu1  ;;  %v530_v23 = vsel %vm508_vm4, %v454_v5, -inf  ;;  %v937_v5 = vld [vmem:[%s3896_s7 + $0x50] sm:$0xff] }
 0x1c6   :  { %v523_v9 = vmax.f32 %v521_v58, %v522_v6  ;;  %v469_v11 = vadd.f32 %v2623_v8, %v3247_v28  ;;  %v463_v12 = vpop.f32.mrb[27].mxu1  ;;  %v2897_v6 = vpack.c.bf16 %v936_v4, %v935_v3  ;;  %v938_v8 = vld [vmem:[%s3896_s7 + $0x58] sm:$0xff] }
 0x1c7   :  { %v464_v13 = vadd.f32 %v3247_v28, %v463_v12  ;;  %2661 = vmatprep.mubr.msk.f32.mxu0 %vm508_vm4, %v3299_v7  ;;  %v2900_v12 = vpack.c.bf16 %v938_v8, %v937_v5 }
 0x1c8   :  { %2662 = vmatmul.mubr.msk.f32.gmra.mrb[8].mxu0 %vm508_vm4, %v3301_v10  ;;  %v3311_v16 = vmax.f32 %v469_v11, 0.0  ;;  %v524_v30 = vrot.slane %v523_v9, 4  ;;  %v533_v38 = vsel %vm508_vm4, %v469_v11, -inf  ;;  %v1017_v11 = vld [vmem:[%s3896_s7 + $0x28] sm:$0xff] }
 0x1c9   :  { %v3309_v14 = vmax.f32 %v464_v13, 0.0  ;;  %v2626_v15 = vpop.f32.mrb[28].mxu1  ;;  %v532_v43 = vsel %vm508_vm4, %v464_v13, -inf }
 0x1ca   :  { %v479_v17 = vadd.f32 %v2626_v15, %v3247_v28  ;;  %v473_v18 = vpop.f32.mrb[29].mxu1  ;;  %v525_v47 = vmax.f32 %v523_v9, %v524_v30  ;;  %v1016_v9 = vld [vmem:[%s3896_s7 + $0x20] sm:$0xff] }
 0x1cb   :  { %v474_v19 = vadd.f32 %v3247_v28, %v473_v18  ;;  %2664 = vmatprep.mubr.msk.f32.mxu0 %vm508_vm4, %v3309_v14  ;;  %v3370_v13 = vpack.c.bf16 %v1017_v11, %v1016_v9 }
 0x1cc   :  { %v536_v21 = vsel %vm508_vm4, %v479_v17, -inf  ;;  %2665 = vmatmul.mubr.msk.f32.gmra.mrb[10].mxu0 %vm508_vm4, %v3311_v16  ;;  %v3325_v31 = vmax.f32 %v479_v17, 0.0  ;;  %v526_v51 = vrot.slane %v525_v47, 2 }
 0x1cd   :  { %v537_v24 = vmax.f32 %v531_v20, %v536_v21  ;;  %v3322_v25 = vmax.f32 %v474_v19, 0.0  ;;  %v534_v26 = vsel %vm508_vm4, %v474_v19, -inf  ;;  %v2629_v29 = vpop.f32.mrb[30].mxu1 }
 0x1ce   :  { %v535_v32 = vmax.f32 %v530_v23, %v534_v26  ;;  %v489_v34 = vadd.f32 %v2629_v29, %v3247_v28  ;;  %v483_v36 = vpop.f32.mrb[31].mxu1  ;;  %v527_v55 = vmax.f32 %v525_v47, %v526_v51 }
 0x1cf   :  { %v484_v37 = vadd.f32 %v3247_v28, %v483_v36  ;;  %2667 = vmatprep.mubr.msk.f32.mxu0 %vm508_vm4, %v3322_v25 }
 0x1d0   :  { %v542_v40 = vmax.f32 %v535_v32, %v537_v24  ;;  %v540_v42 = vsel %vm508_vm4, %v489_v34, -inf  ;;  %2668 = vmatmul.mubr.msk.f32.gmra.mrb[12].mxu0 %vm508_vm4, %v3325_v31  ;;  %v3339_v28 = vmax.f32 %v489_v34, 0.0  ;;  %v528_v58 = vrot.slane %v527_v55, 1 }
 0x1d1   :  { %v541_v44 = vmax.f32 %v533_v38, %v540_v42  ;;  %v3336_v45 = vmax.f32 %v484_v37, 0.0  ;;  %v538_v46 = vsel %vm508_vm4, %v484_v37, -inf }
 0x1d2   :  { %v539_v48 = vmax.f32 %v532_v43, %v538_v46  ;;  %v529_v61 = vmax.f32 %v527_v55, %v528_v58 }
 0x1d3   :  { %2670 = vmatprep.mubr.msk.f32.mxu0 %vm508_vm4, %v3336_v45 }
 0x1d4   :  { %v543_v50 = vmax.f32 %v539_v48, %v541_v44  ;;  %2671 = vmatmul.mubr.msk.f32.gmra.mrb[14].mxu0 %vm508_vm4, %v3339_v28 }
 0x1d5   :  { %2756 = vmatprep.mubr.msk.f32.mxu0 %vm3031_vm3, %v3903_v27 }
 0x1d6   :  { %v544_v53 = vmax.f32 %v542_v40, %v543_v50  ;;  %v828_v40 = vlaneseq }
 0x1d8   :  { %v545_v54 = vrot.slane %v544_v53, 4  ;;  %v829_v42 = vshrl.u32 %v828_v40, 7 }
 0x1da   :  { %v546_v56 = vmax.f32 %v544_v53, %v545_v54  ;;  %v3373_v43 = vsub.s32 0, %v829_v42  ;;  %v3375_v44 = vsub.s32 1, %v829_v42 }
 0x1dc   :  { %v547_v57 = vrot.slane %v546_v56, 2  ;;  %3931 = vst [vmem:[#allocation5_spill] sm:$0xff] %v3373_v43  ;;  %3932 = vst [vmem:[#allocation6_spill] sm:$0xff] %v3375_v44 }
 0x1de   :  { %v548_v59 = vmax.f32 %v546_v56, %v547_v57 }
 0x1e0   :  { %v549_v60 = vrot.slane %v548_v59, 1 }
 0x1e2   :  { %v550_v63 = vmax.f32 %v548_v59, %v549_v60  ;;  %v2296_v60 = vld [vmem:[%s3895_s6] ss:$0 sm:$0xff] }
 0x1e4   :  { %v552_v0 = vsel %vm551_vm5, %v529_v61, %v550_v63 }
 0x1e5   :  { %v553_v2 = vmax.f32 %v552_v0, 0.0 }
 0x1e7   :  { %2639 = vmatmul.mubr.msk.f32.vlgmr.msra.gmra.mrb[32].mxu1 %vm508_vm4, %v553_v2 }
 0x1e8   :  { %2681 = vmatprep.mubr.msk.f32.mxu1 %vm3031_vm3, %v3903_v27  ;;  %2898 = vmatpush3.bf16.msra.mxu1 %v2897_v6 }
 0x1e9   :  { %2899 = vmatprep.subr.bf16.mxu1 %v3904_v22 }
 0x1ec   :  { %2901 = vmatpush3.bf16.msra.mxu1 %v2900_v12 }
 0x1ed   :  { %2903 = vmatprep.subr.bf16.mxu1 %v3370_v13 }
 0x28b   :  { %v2651_v15 = vpop.f32.mrb[0].mxu0 }
 0x28c   :  { %v749_v17 = vpop.f32.mrb[1].mxu0 }
 0x28f   :  { %v2654_v18 = vpop.f32.mrb[2].mxu0 }
 0x290   :  { %v759_v19 = vpop.f32.mrb[3].mxu0 }
 0x293   :  { %v2657_v20 = vpop.f32.mrb[4].mxu0 }
 0x294   :  { %v769_v21 = vpop.f32.mrb[5].mxu0 }
 0x297   :  { %v2660_v23 = vpop.f32.mrb[6].mxu0 }
 0x298   :  { %v779_v24 = vpop.f32.mrb[7].mxu0 }
 0x29b   :  { %v2663_v26 = vpop.f32.mrb[8].mxu0 }
 0x29c   :  { %v789_v29 = vpop.f32.mrb[9].mxu0 }
 0x29f   :  { %v2666_v30 = vpop.f32.mrb[10].mxu0 }
 0x2a0   :  { %v799_v32 = vpop.f32.mrb[11].mxu0 }
 0x2a3   :  { %v2669_v34 = vpop.f32.mrb[12].mxu0 }
 0x2a4   :  { %v809_v36 = vpop.f32.mrb[13].mxu0 }
 0x2a7   :  { %v2672_v37 = vpop.f32.mrb[14].mxu0 }
 0x2a8   :  { %v819_v38 = vpop.f32.mrb[15].mxu0 }
 0x2ba   :  { %v627_v46 = vpop.f32.mrb[32].mxu1 }
 0x2bb   :  { %v831_v47 = vrot.slane %v627_v46, %v3373_v43  ;;  %v843_v48 = vrot.slane %v627_v46, %v3375_v44  ;;  %v2640_v50 = vpop.f32.mrb[33].mxu1 }
 0x2bd   :  { %v832_v51 = vadd.f32 %v831_v47, %v749_v17  ;;  %v833_v53 = vadd.f32 %v2651_v15, %v831_v47  ;;  %v834_v54 = vadd.f32 %v831_v47, %v759_v19  ;;  %v835_v55 = vadd.f32 %v2654_v18, %v831_v47 }
 0x2be   :  { %v836_v56 = vadd.f32 %v831_v47, %v769_v21  ;;  %v837_v57 = vadd.f32 %v2657_v20, %v831_v47  ;;  %v838_v58 = vadd.f32 %v831_v47, %v779_v24  ;;  %v839_v59 = vadd.f32 %v2660_v23, %v831_v47 }
 0x2bf   :  { %v844_v61 = vadd.f32 %v843_v48, %v789_v29  ;;  %v845_v63 = vadd.f32 %v2663_v26, %v843_v48  ;;  %v846_v0 = vadd.f32 %v843_v48, %v799_v32  ;;  %v847_v2 = vadd.f32 %v2666_v30, %v843_v48 }
 0x2c0   :  { %v848_v3 = vadd.f32 %v843_v48, %v809_v36  ;;  %v849_v4 = vadd.f32 %v2669_v34, %v843_v48  ;;  %v850_v5 = vadd.f32 %v843_v48, %v819_v38  ;;  %v851_v6 = vadd.f32 %v2672_v37, %v843_v48 }
 0x2c1   :  { %v3382_v8 = vadd.f32 %v2296_v60, %v832_v51  ;;  %v3384_v9 = vadd.f32 %v2296_v60, %v833_v53  ;;  %v3386_v11 = vadd.f32 %v2296_v60, %v834_v54  ;;  %v3388_v12 = vadd.f32 %v2296_v60, %v835_v55 }
 0x2c2   :  { %v3390_v15 = vadd.f32 %v2296_v60, %v836_v56  ;;  %v3392_v17 = vadd.f32 %v2296_v60, %v837_v57  ;;  %v3394_v18 = vadd.f32 %v2296_v60, %v838_v58  ;;  %v3396_v19 = vadd.f32 %v2296_v60, %v839_v59 }
 0x2c3   :  { %v3398_v20 = vadd.f32 %v2296_v60, %v844_v61  ;;  %v3400_v21 = vadd.f32 %v2296_v60, %v845_v63  ;;  %v3402_v23 = vadd.f32 %v2296_v60, %v846_v0  ;;  %v3404_v24 = vadd.f32 %v2296_v60, %v847_v2 }
 0x2c4   :  { %v3406_v26 = vadd.f32 %v2296_v60, %v848_v3  ;;  %v3408_v29 = vadd.f32 %v2296_v60, %v849_v4  ;;  %v3410_v30 = vadd.f32 %v2296_v60, %v850_v5  ;;  %v3412_v32 = vadd.f32 %v2296_v60, %v851_v6 }
 0x2c5   :  { %v891_v34 = vsel %vm508_vm4, %v3382_v8, -inf  ;;  %v892_v36 = vsel %vm508_vm4, %v3384_v9, -inf  ;;  %v893_v37 = vsel %vm508_vm4, %v3386_v11, -inf  ;;  %v894_v38 = vsel %vm508_vm4, %v3388_v12, -inf }
 0x2c6   :  { %v895_v40 = vsel %vm508_vm4, %v3390_v15, -inf  ;;  %v897_v42 = vsel %vm508_vm4, %v3392_v17, -inf  ;;  %v899_v46 = vsel %vm508_vm4, %v3394_v18, -inf  ;;  %v901_v47 = vsel %vm508_vm4, %v3396_v19, -inf }
 0x2c7   :  { %v896_v48 = vmax.f32 %v891_v34, %v895_v40  ;;  %v898_v50 = vmax.f32 %v892_v36, %v897_v42  ;;  %v900_v51 = vmax.f32 %v893_v37, %v899_v46  ;;  %v902_v53 = vmax.f32 %v894_v38, %v901_v47 }
 0x2c8   :  { %v912_v54 = vsel %vm508_vm4, %v3398_v20, -inf  ;;  %v913_v55 = vsel %vm508_vm4, %v3400_v21, -inf  ;;  %v914_v56 = vsel %vm508_vm4, %v3402_v23, -inf  ;;  %v915_v57 = vsel %vm508_vm4, %v3404_v24, -inf }
 0x2c9   :  { %v903_v58 = vmax.f32 %v896_v48, %v898_v50  ;;  %v904_v59 = vmax.f32 %v900_v51, %v902_v53  ;;  %v916_v60 = vsel %vm508_vm4, %v3406_v26, -inf  ;;  %v918_v61 = vsel %vm508_vm4, %v3408_v29, -inf }
 0x2ca   :  { %v917_v63 = vmax.f32 %v912_v54, %v916_v60  ;;  %v919_v0 = vmax.f32 %v913_v55, %v918_v61  ;;  %v920_v2 = vsel %vm508_vm4, %v3410_v30, -inf  ;;  %v922_v3 = vsel %vm508_vm4, %v3412_v32, -inf }
 0x2cb   :  { %v905_v4 = vmax.f32 %v903_v58, %v904_v59  ;;  %v921_v5 = vmax.f32 %v914_v56, %v920_v2  ;;  %v923_v6 = vmax.f32 %v915_v57, %v922_v3  ;;  %v1018_v56 = vld [vmem:[%s3896_s7 + $0x30] sm:$0xff]  ;;  %v1019_v57 = vld [vmem:[%s3896_s7 + $0x38] sm:$0xff]  ;;  %v1013_v2 = vld [vmem:[%s3896_s7 + $0x8] sm:$0xff] }
 0x2cc   :  { %v924_v34 = vmax.f32 %v917_v63, %v919_v0  ;;  %v2906_v61 = vpack.c.bf16 %v1019_v57, %v1018_v56  ;;  %v3921_v63 = vmax.f32 %v3382_v8, 0.0  ;;  %v1012_v0 = vld [vmem:[%s3896_s7] sm:$0xff]  ;;  %v1466_v56 = vld [vmem:[%s3898_s9 + $0x68] sm:$0xff] }
 0x2cd   :  { %v906_v36 = vrot.slane %v905_v4, 4  ;;  %v925_v37 = vmax.f32 %v921_v5, %v923_v6  ;;  %v2910_v3 = vpack.c.bf16 %v1013_v2, %v1012_v0  ;;  %v1015_v5 = vld [vmem:[%s3896_s7 + $0x18] sm:$0xff]  ;;  %v3920_v6 = vmax.f32 %v3384_v9, 0.0  ;;  %v1547_v2 = vld [vmem:[%s3898_s9 + $0x28] sm:$0xff] }
 0x2cf   :  { %v907_v38 = vmax.f32 %v905_v4, %v906_v36  ;;  %v926_v40 = vmax.f32 %v924_v34, %v925_v37  ;;  %v1014_v4 = vld [vmem:[%s3896_s7 + $0x10] sm:$0xff]  ;;  %v3918_v36 = vmax.f32 %v3388_v12, 0.0  ;;  %v3917_v37 = vmax.f32 %v3390_v15, 0.0 }
 0x2d0   :  { %v2914_v34 = vpack.c.bf16 %v1015_v5, %v1014_v4 }
 0x2d1   :  { %v908_v42 = vrot.slane %v907_v38, 2  ;;  %v927_v46 = vrot.slane %v926_v40, 4 }
 0x2d3   :  { %v909_v47 = vmax.f32 %v907_v38, %v908_v42  ;;  %v928_v48 = vmax.f32 %v926_v40, %v927_v46  ;;  %v3916_v38 = vmax.f32 %v3392_v17, 0.0  ;;  %v3915_v40 = vmax.f32 %v3394_v18, 0.0 }
 0x2d4   :  { %v3914_v42 = vmax.f32 %v3396_v19, 0.0  ;;  %v3913_v46 = vmax.f32 %v3398_v20, 0.0 }
 0x2d5   :  { %v910_v50 = vrot.slane %v909_v47, 1  ;;  %v929_v51 = vrot.slane %v928_v48, 2 }
 0x2d7   :  { %v930_v53 = vmax.f32 %v928_v48, %v929_v51  ;;  %v911_v54 = vmax.f32 %v909_v47, %v910_v50  ;;  %v3912_v47 = vmax.f32 %v3400_v21, 0.0  ;;  %v3911_v48 = vmax.f32 %v3402_v23, 0.0 }
 0x2d8   :  { %v3910_v50 = vmax.f32 %v3404_v24, 0.0  ;;  %v3909_v51 = vmax.f32 %v3406_v26, 0.0 }
 0x2d9   :  { %v931_v55 = vrot.slane %v930_v53, 1 }
 0x2db   :  { %v932_v60 = vmax.f32 %v930_v53, %v931_v55  ;;  %v3908_v53 = vmax.f32 %v3408_v29, 0.0  ;;  %v3906_v55 = vmax.f32 %v3412_v32, 0.0 }
 0x2dd   :  { %v933_v58 = vsel %vm551_vm5, %v911_v54, %v932_v60  ;;  %v3907_v54 = vmax.f32 %v3410_v30, 0.0  ;;  %v1465_v60 = vld [vmem:[%s3898_s9 + $0x60] sm:$0xff] }
 0x2de   :  { %v934_v59 = vmax.f32 %v933_v58, 0.0  ;;  %v2919_v57 = vpack.c.bf16 %v1466_v56, %v1465_v60  ;;  %v1467_v58 = vld [vmem:[%s3898_s9 + $0x70] sm:$0xff] }
 0x2e0   :  { %2682 = vmatmul.mubr.msk.f32.vlgmr.msra.gmra.mrb[34].mxu1 %vm508_vm4, %v934_v59  ;;  %2920 = vmatpush3.bf16.msra.mxu0 %v2919_v57  ;;  %v1468_v59 = vld [vmem:[%s3898_s9 + $0x78] sm:$0xff] }
 0x2e1   :  { %2905 = vmatpush3.bf16.msra.mxu1 %v3370_v13  ;;  %2692 = vmatprep.mubr.msk.f32.mxu1 %vm508_vm4, %v3921_v63  ;;  %v3919_v13 = vmax.f32 %v3386_v11, 0.0  ;;  %v2922_v0 = vpack.c.bf16 %v1468_v59, %v1467_v58  ;;  %v3589_v58 = vld [vmem:[%s3897_s8] ss:$0 sm:$0xff] }
 0x2e2   :  { %2907 = vmatprep.subr.bf16.mxu1 %v2906_v61  ;;  %2921 = vmatprep.subr.bf16.mxu0 %v3904_v22 }
 0x2e4   :  { %2923 = vmatpush3.bf16.msra.mxu0 %v2922_v0 }
 0x2e5   :  { %2909 = vmatpush3.bf16.msra.mxu1 %v2906_v61  ;;  %v1546_v61 = vld [vmem:[%s3898_s9 + $0x20] sm:$0xff] }
 0x2e6   :  { %2911 = vmatprep.subr.bf16.mxu1 %v2910_v3 }
 0x2e8   :  { %2693 = vmatmul.mubr.msk.f32.vlgmr.msra.gmra.mrb[36].mxu1 %vm508_vm4, %v3920_v6 }
 0x2e9   :  { %2695 = vmatprep.mubr.msk.f32.mxu1 %vm508_vm4, %v3919_v13  ;;  %2913 = vmatpush3.bf16.msra.mxu1 %v2910_v3  ;;  %v3582_v3 = vpack.c.bf16 %v1547_v2, %v1546_v61 }
 0x2ea   :  { %2915 = vmatprep.subr.bf16.mxu1 %v2914_v34 }
 0x2eb   :  { %2925 = vmatprep.subr.bf16.mxu0 %v3582_v3 }
 0x2ec   :  { %2696 = vmatmul.mubr.msk.f32.gmra.mrb[38].mxu1 %vm508_vm4, %v3918_v36 }
 0x2ed   :  { %2698 = vmatprep.mubr.msk.f32.mxu1 %vm508_vm4, %v3917_v37  ;;  %2917 = vmatpush3.bf16.msra.mxu1 %v2914_v34 }
 0x2f0   :  { %2699 = vmatmul.mubr.msk.f32.gmra.mrb[40].mxu1 %vm508_vm4, %v3916_v38 }
 0x2f1   :  { %2701 = vmatprep.mubr.msk.f32.mxu1 %vm508_vm4, %v3915_v40 }
 0x2f4   :  { %2702 = vmatmul.mubr.msk.f32.gmra.mrb[42].mxu1 %vm508_vm4, %v3914_v42 }
 0x2f5   :  { %2704 = vmatprep.mubr.msk.f32.mxu1 %vm508_vm4, %v3913_v46 }
 0x2f8   :  { %2705 = vmatmul.mubr.msk.f32.gmra.mrb[44].mxu1 %vm508_vm4, %v3912_v47 }
 0x2f9   :  { %2707 = vmatprep.mubr.msk.f32.mxu1 %vm508_vm4, %v3911_v48 }
 0x2fc   :  { %2708 = vmatmul.mubr.msk.f32.gmra.mrb[46].mxu1 %vm508_vm4, %v3910_v50 }
 0x2fd   :  { %2710 = vmatprep.mubr.msk.f32.mxu1 %vm508_vm4, %v3909_v51 }
 0x300   :  { %2711 = vmatmul.mubr.msk.f32.gmra.mrb[48].mxu1 %vm508_vm4, %v3908_v53 }
 0x301   :  { %2713 = vmatprep.mubr.msk.f32.mxu1 %vm508_vm4, %v3907_v54 }
 0x304   :  { %2714 = vmatmul.mubr.msk.f32.gmra.mrb[50].mxu1 %vm508_vm4, %v3906_v55 }
 0x305   :  { %2724 = vmatprep.mubr.msk.f32.mxu1 %vm508_vm4, %v3251_v33 }
 0x308   :  { %2725 = vmatmul.mubr.msk.f32.vlgmr.msra.gmra.mrb[36].mxu1 %vm508_vm4, %v3253_v35 }
 0x309   :  { %2727 = vmatprep.mubr.msk.f32.mxu1 %vm508_vm4, %v3261_v39 }
 0x30c   :  { %2728 = vmatmul.mubr.msk.f32.gmra.mrb[38].mxu1 %vm508_vm4, %v3263_v41 }
 0x30d   :  { %2730 = vmatprep.mubr.msk.f32.mxu1 %vm508_vm4, %v3274_v49 }
 0x310   :  { %2731 = vmatmul.mubr.msk.f32.gmra.mrb[40].mxu1 %vm508_vm4, %v3277_v52 }
 0x311   :  { %2733 = vmatprep.mubr.msk.f32.mxu1 %vm508_vm4, %v3288_v62 }
 0x314   :  { %2734 = vmatmul.mubr.msk.f32.gmra.mrb[42].mxu1 %vm508_vm4, %v3291_v1 }
 0x315   :  { %2736 = vmatprep.mubr.msk.f32.mxu1 %vm508_vm4, %v3299_v7 }
 0x318   :  { %2737 = vmatmul.mubr.msk.f32.gmra.mrb[44].mxu1 %vm508_vm4, %v3301_v10 }
 0x319   :  { %2739 = vmatprep.mubr.msk.f32.mxu1 %vm508_vm4, %v3309_v14 }
 0x31c   :  { %2740 = vmatmul.mubr.msk.f32.gmra.mrb[46].mxu1 %vm508_vm4, %v3311_v16 }
 0x31d   :  { %2742 = vmatprep.mubr.msk.f32.mxu1 %vm508_vm4, %v3322_v25 }
 0x320   :  { %2743 = vmatmul.mubr.msk.f32.gmra.mrb[48].mxu1 %vm508_vm4, %v3325_v31 }
 0x321   :  { %2745 = vmatprep.mubr.msk.f32.mxu1 %vm508_vm4, %v3336_v45 }
 0x324   :  { %2746 = vmatmul.mubr.msk.f32.gmra.mrb[50].mxu1 %vm508_vm4, %v3339_v28 }
 0x3b3   :  { %v1008_v4 = vpop.f32.mrb[34].mxu1 }
 0x3b4   :  { %v2683_v5 = vpop.f32.mrb[35].mxu1  ;;  %v1361_v34 = vrot.slane %v1008_v4, %v3373_v43  ;;  %v1373_v46 = vrot.slane %v1008_v4, %v3375_v44 }
 0x3db   :  { %v2726_v60 = vpop.f32.mrb[36].mxu1 }
 0x3dc   :  { %v1363_v56 = vadd.f32 %v2726_v60, %v1361_v34  ;;  %v1279_v57 = vpop.f32.mrb[37].mxu1 }
 0x3dd   :  { %v1362_v27 = vadd.f32 %v1361_v34, %v1279_v57 }
 0x3de   :  { %v3592_v0 = vadd.f32 %v3589_v58, %v1363_v56 }
 0x3df   :  { %v2729_v22 = vpop.f32.mrb[38].mxu1  ;;  %v3595_v5 = vadd.f32 %v3589_v58, %v1362_v27 }
 0x3e0   :  { %v1365_v59 = vadd.f32 %v2729_v22, %v1361_v34  ;;  %v1289_v61 = vpop.f32.mrb[39].mxu1  ;;  %v1422_v51 = vsel %vm508_vm4, %v3592_v0, -inf }
 0x3e1   :  { %v1364_v2 = vadd.f32 %v1361_v34, %v1289_v61  ;;  %v1421_v56 = vsel %vm508_vm4, %v3595_v5, -inf }
 0x3e2   :  { %v3608_v50 = vadd.f32 %v3589_v58, %v1365_v59 }
 0x3e3   :  { %v2732_v55 = vpop.f32.mrb[40].mxu1 }
 0x3e4   :  { %v1367_v54 = vadd.f32 %v2732_v55, %v1361_v34  ;;  %v1299_v60 = vpop.f32.mrb[41].mxu1 }
 0x3e5   :  { %v1366_v53 = vadd.f32 %v1361_v34, %v1299_v60 }
 0x3e6   :  { %v3598_v57 = vadd.f32 %v3589_v58, %v1367_v54  ;;  %v3613_v54 = vadd.f32 %v3589_v58, %v1364_v2 }
 0x3e7   :  { %v3603_v22 = vadd.f32 %v3589_v58, %v1366_v53  ;;  %v2735_v61 = vpop.f32.mrb[42].mxu1 }
 0x3e8   :  { %v1427_v27 = vsel %vm508_vm4, %v3598_v57, -inf  ;;  %v1369_v55 = vadd.f32 %v2735_v61, %v1361_v34  ;;  %v1309_v60 = vpop.f32.mrb[43].mxu1  ;;  %v1424_v61 = vsel %vm508_vm4, %v3608_v50, -inf  ;;  %v1423_v4 = vsel %vm508_vm4, %v3613_v54, -inf }
 0x3e9   :  { %v1428_v48 = vmax.f32 %v1422_v51, %v1427_v27  ;;  %v1425_v53 = vsel %vm508_vm4, %v3603_v22, -inf  ;;  %v1368_v47 = vadd.f32 %v1361_v34, %v1309_v60 }
 0x3ea   :  { %v1426_v42 = vmax.f32 %v1421_v56, %v1425_v53  ;;  %v3619_v40 = vadd.f32 %v3589_v58, %v1369_v55 }
 0x3eb   :  { %v3622_v59 = vadd.f32 %v3589_v58, %v1368_v47  ;;  %v2738_v38 = vpop.f32.mrb[44].mxu1 }
 0x3ec   :  { %3933 = vst [vmem:[#allocation7_spill] sm:$0xff] %v3619_v40  ;;  %v1433_v2 = vmax.f32 %v1426_v42, %v1428_v48  ;;  %v1431_v51 = vsel %vm508_vm4, %v3619_v40, -inf  ;;  %v1375_v27 = vadd.f32 %v2738_v38, %v1373_v46  ;;  %v1319_v37 = vpop.f32.mrb[45].mxu1 }
 0x3ed   :  { %v1432_v34 = vmax.f32 %v1424_v61, %v1431_v51  ;;  %v1429_v56 = vsel %vm508_vm4, %v3622_v59, -inf  ;;  %v1374_v55 = vadd.f32 %v1373_v46, %v1319_v37 }
 0x3ee   :  { %v1430_v47 = vmax.f32 %v1423_v4, %v1429_v56  ;;  %v3633_v48 = vadd.f32 %v3589_v58, %v1375_v27 }
 0x3ef   :  { %v2741_v60 = vpop.f32.mrb[46].mxu1  ;;  %v3636_v63 = vadd.f32 %v3589_v58, %v1374_v55 }
 0x3f0   :  { %v1434_v53 = vmax.f32 %v1430_v47, %v1432_v34  ;;  %v1377_v36 = vadd.f32 %v2741_v60, %v1373_v46  ;;  %v1329_v13 = vpop.f32.mrb[47].mxu1  ;;  %3934 = vst [vmem:[#allocation8_spill] sm:$0xff] %v3633_v48  ;;  %v1443_v37 = vsel %vm508_vm4, %v3633_v48, -inf }
 0x3f1   :  { %v1376_v6 = vadd.f32 %v1373_v46, %v1329_v13  ;;  %3935 = vst [vmem:[#allocation9_spill] sm:$0xff] %v3636_v63 }
 0x3f2   :  { %v1435_v42 = vmax.f32 %v1433_v2, %v1434_v53  ;;  %v1442_v2 = vsel %vm508_vm4, %v3636_v63, -inf  ;;  %v3649_v27 = vadd.f32 %v3589_v58, %v1377_v36 }
 0x3f3   :  { %v2744_v38 = vpop.f32.mrb[48].mxu1 }
 0x3f4   :  { %v1379_v44 = vadd.f32 %v2744_v38, %v1373_v46  ;;  %v1339_v61 = vpop.f32.mrb[49].mxu1  ;;  %3938 = vst [vmem:[#allocation12_spill] sm:$0xff] %v3649_v27  ;;  %v1436_v38 = vrot.slane %v1435_v42, 4 }
 0x3f5   :  { %v1378_v51 = vadd.f32 %v1373_v46, %v1339_v61 }
 0x3f6   :  { %v3639_v43 = vadd.f32 %v3589_v58, %v1379_v44  ;;  %v3654_v44 = vadd.f32 %v3589_v58, %v1376_v6 }
 0x3f7   :  { %v3644_v4 = vadd.f32 %v3589_v58, %v1378_v51  ;;  %v2747_v13 = vpop.f32.mrb[50].mxu1 }
 0x3f8   :  { %3936 = vst [vmem:[#allocation10_spill] sm:$0xff] %v3639_v43  ;;  %v1448_v34 = vsel %vm508_vm4, %v3639_v43, -inf  ;;  %v1381_v56 = vadd.f32 %v2747_v13, %v1373_v46  ;;  %v1349_v55 = vpop.f32.mrb[51].mxu1  ;;  %v1445_v13 = vsel %vm508_vm4, %v3649_v27, -inf }
 0x3f9   :  { %3937 = vst [vmem:[#allocation11_spill] sm:$0xff] %v3644_v4  ;;  %v1449_v47 = vmax.f32 %v1443_v37, %v1448_v34  ;;  %v1446_v60 = vsel %vm508_vm4, %v3644_v4, -inf  ;;  %v1380_v53 = vadd.f32 %v1373_v46, %v1349_v55  ;;  %v1444_v37 = vsel %vm508_vm4, %v3654_v44, -inf }
 0x3fa   :  { %v1447_v61 = vmax.f32 %v1442_v2, %v1446_v60  ;;  %v3659_v51 = vadd.f32 %v3589_v58, %v1381_v56  ;;  %v1437_v2 = vmax.f32 %v1435_v42, %v1436_v38  ;;  %v1549_v42 = vld [vmem:[%s3898_s9 + $0x38] sm:$0xff] }
 0x3fb   :  { %v3662_v36 = vadd.f32 %v3589_v58, %v1380_v53 }
 0x3fc   :  { %3939 = vst [vmem:[#allocation13_spill] sm:$0xff] %v3659_v51  ;;  %v1454_v43 = vmax.f32 %v1447_v61, %v1449_v47  ;;  %v1452_v6 = vsel %vm508_vm4, %v3659_v51, -inf  ;;  %v1438_v60 = vrot.slane %v1437_v2, 2 }
 0x3fd   :  { %v1453_v34 = vmax.f32 %v1445_v13, %v1452_v6  ;;  %v1450_v46 = vsel %vm508_vm4, %v3662_v36, -inf  ;;  %v1548_v13 = vld [vmem:[%s3898_s9 + $0x30] sm:$0xff] }
 0x3fe   :  { %v1451_v56 = vmax.f32 %v1444_v37, %v1450_v46  ;;  %v1439_v4 = vmax.f32 %v1437_v2, %v1438_v60  ;;  %v2928_v6 = vpack.c.bf16 %v1549_v42, %v1548_v13  ;;  %v1542_v37 = vld [vmem:[%s3898_s9] sm:$0xff]  ;;  %v3942_v46 = vmax.f32 %v3386_v11, 0.0 }
 0x3ff   :  { %v3946_v11 = vmax.f32 %v3394_v18, 0.0  ;;  %v3947_v60 = vmax.f32 %v3396_v19, 0.0  ;;  %v3951_v18 = vmax.f32 %v3404_v24, 0.0  ;;  %v3952_v19 = vmax.f32 %v3406_v26, 0.0  ;;  %v1843_v24 = vld [vmem:[%s3898_s9 + $0x58] sm:$0xff] }
 0x400   :  { %v1455_v55 = vmax.f32 %v1451_v56, %v1453_v34  ;;  %v1440_v47 = vrot.slane %v1439_v4, 1  ;;  %v3941_v34 = vmax.f32 %v3384_v9, 0.0  ;;  %v3943_v56 = vmax.f32 %v3388_v12, 0.0 }
 0x401   :  { %v3945_v9 = vmax.f32 %v3392_v17, 0.0  ;;  %v3948_v12 = vmax.f32 %v3398_v20, 0.0  ;;  %v3950_v17 = vmax.f32 %v3402_v23, 0.0  ;;  %v3953_v20 = vmax.f32 %v3408_v29, 0.0  ;;  %v1842_v23 = vld [vmem:[%s3898_s9 + $0x50] sm:$0xff] }
 0x402   :  { %v1456_v58 = vmax.f32 %v1454_v43, %v1455_v55  ;;  %v1441_v51 = vmax.f32 %v1439_v4, %v1440_v47  ;;  %v1544_v4 = vld [vmem:[%s3898_s9 + $0x10] sm:$0xff]  ;;  %v3944_v55 = vmax.f32 %v3390_v15, 0.0  ;;  %v3949_v15 = vmax.f32 %v3400_v21, 0.0  ;;  %v2147_v47 = vld [vmem:[%s3900_s11 + $0x18] sm:$0xff] }
 0x403   :  { %v3954_v21 = vmax.f32 %v3410_v30, 0.0  ;;  %v3955_v26 = vmax.f32 %v3412_v32, 0.0  ;;  %v2944_v29 = vpack.c.bf16 %v1843_v24, %v1842_v23  ;;  %v3956_v30 = vmov 0.0|0.0   ;;  %v3961_v32 = vld [vmem:[#allocation11_spill] sm:$0xff] }
 0x404   :  { %v1457_v53 = vrot.slane %v1456_v58, 4 }
 0x406   :  { %v1458_v48 = vmax.f32 %v1456_v58, %v1457_v53  ;;  %v2145_v58 = vld [vmem:[%s3900_s11 + $0x8] sm:$0xff]  ;;  %v2146_v53 = vld [vmem:[%s3900_s11 + $0x10] sm:$0xff] }
 0x408   :  { %v1459_v27 = vrot.slane %v1458_v48, 2 }
 0x40a   :  { %v1460_v61 = vmax.f32 %v1458_v48, %v1459_v27  ;;  %v3940_v48 = vmax.f32 %v3382_v8, 0.0  ;;  %v1545_v27 = vld [vmem:[%s3898_s9 + $0x18] sm:$0xff]  ;;  %v1841_v8 = vld [vmem:[%s3898_s9 + $0x48] sm:$0xff] }
 0x40c   :  { %v1461_v63 = vrot.slane %v1460_v61, 1 }
 0x40e   :  { %v1462_v40 = vmax.f32 %v1460_v61, %v1461_v63  ;;  %v1543_v63 = vld [vmem:[%s3898_s9 + $0x8] sm:$0xff]  ;;  %v2952_v61 = vpack.c.bf16 %v2147_v47, %v2146_v53 }
 0x410   :  { %v1463_v38 = vsel %vm551_vm5, %v1441_v51, %v1462_v40  ;;  %v2932_v40 = vpack.c.bf16 %v1543_v63, %v1542_v37  ;;  %v2936_v51 = vpack.c.bf16 %v1545_v27, %v1544_v4  ;;  %v3837_v4 = vld [vmem:[%s3899_s10] ss:$0 sm:$0xff] }
 0x411   :  { %v1464_v43 = vmax.f32 %v1463_v38, 0.0  ;;  %v3965_v38 = vld [vmem:[#allocation5_spill] sm:$0xff] }
 0x413   :  { %2757 = vmatmul.mubr.msk.f32.vlgmr.msra.gmra.mrb[16].mxu0 %vm508_vm4, %v1464_v43 }
 0x414   :  { %2927 = vmatpush3.bf16.msra.mxu0 %v3582_v3  ;;  %2767 = vmatprep.mubr.msk.f32.mxu0 %vm508_vm4, %v3940_v48  ;;  %v1840_v3 = vld [vmem:[%s3898_s9 + $0x40] sm:$0xff] }
 0x415   :  { %2929 = vmatprep.subr.bf16.mxu0 %v2928_v6  ;;  %v2940_v2 = vpack.c.bf16 %v1841_v8, %v1840_v3 }
 0x418   :  { %2931 = vmatpush3.bf16.msra.mxu0 %v2928_v6 }
 0x419   :  { %2933 = vmatprep.subr.bf16.mxu0 %v2932_v40 }
 0x41b   :  { %2768 = vmatmul.mubr.msk.f32.vlgmr.msra.gmra.mrb[18].mxu0 %vm508_vm4, %v3941_v34 }
 0x41c   :  { %2770 = vmatprep.mubr.msk.f32.mxu0 %vm508_vm4, %v3942_v46  ;;  %2935 = vmatpush3.bf16.msra.mxu0 %v2932_v40 }
 0x41d   :  { %2937 = vmatprep.subr.bf16.mxu0 %v2936_v51 }
 0x41f   :  { %2771 = vmatmul.mubr.msk.f32.gmra.mrb[20].mxu0 %vm508_vm4, %v3943_v56 }
 0x420   :  { %2773 = vmatprep.mubr.msk.f32.mxu0 %vm508_vm4, %v3944_v55  ;;  %2939 = vmatpush3.bf16.msra.mxu0 %v2936_v51 }
 0x421   :  { %2941 = vmatprep.subr.bf16.mxu0 %v2940_v2 }
 0x423   :  { %2774 = vmatmul.mubr.msk.f32.gmra.mrb[22].mxu0 %vm508_vm4, %v3945_v9 }
 0x424   :  { %2776 = vmatprep.mubr.msk.f32.mxu0 %vm508_vm4, %v3946_v11 }
 0x427   :  { %2777 = vmatmul.mubr.msk.f32.gmra.mrb[24].mxu0 %vm508_vm4, %v3947_v60 }
 0x428   :  { %2779 = vmatprep.mubr.msk.f32.mxu0 %vm508_vm4, %v3948_v12 }
 0x42b   :  { %2780 = vmatmul.mubr.msk.f32.gmra.mrb[26].mxu0 %vm508_vm4, %v3949_v15 }
 0x42c   :  { %2782 = vmatprep.mubr.msk.f32.mxu0 %vm508_vm4, %v3950_v17 }
 0x42f   :  { %2783 = vmatmul.mubr.msk.f32.gmra.mrb[28].mxu0 %vm508_vm4, %v3951_v18 }
 0x430   :  { %2785 = vmatprep.mubr.msk.f32.mxu0 %vm508_vm4, %v3952_v19 }
 0x433   :  { %2786 = vmatmul.mubr.msk.f32.gmra.mrb[30].mxu0 %vm508_vm4, %v3953_v20 }
 0x434   :  { %2788 = vmatprep.mubr.msk.f32.mxu0 %vm508_vm4, %v3954_v21 }
 0x437   :  { %2789 = vmatmul.mubr.msk.f32.gmra.mrb[32].mxu0 %vm508_vm4, %v3955_v26 }
 0x438   :  { %2799 = vmatprep.mubr.msk.f32.mxu0 %vm508_vm4, %v3251_v33  ;;  %v1405_v33 = vmax.f32 %v3595_v5, 0.0 }
 0x43b   :  { %2800 = vmatmul.mubr.msk.f32.vlgmr.msra.gmra.mrb[18].mxu0 %vm508_vm4, %v3253_v35  ;;  %v1406_v35 = vmax.f32 %v3592_v0, 0.0  ;;  %v3962_v0 = vld [vmem:[#allocation10_spill] sm:$0xff] }
 0x43c   :  { %2802 = vmatprep.mubr.msk.f32.mxu0 %vm508_vm4, %v3261_v39  ;;  %2943 = vmatpush3.bf16.msra.mxu0 %v2940_v2  ;;  %v1407_v39 = vmax.f32 %v3613_v54, 0.0  ;;  %v1418_v5 = vmax.f32 %v3962_v0, 0.0 }
 0x43d   :  { %2945 = vmatprep.subr.bf16.mxu0 %v2944_v29 }
 0x43f   :  { %2803 = vmatmul.mubr.msk.f32.gmra.mrb[20].mxu0 %vm508_vm4, %v3263_v41  ;;  %v1408_v41 = vmax.f32 %v3608_v50, 0.0  ;;  %v1417_v50 = vmax.f32 %v3961_v32, 0.0 }
 0x440   :  { %2805 = vmatprep.mubr.msk.f32.mxu0 %vm508_vm4, %v3274_v49  ;;  %2947 = vmatpush3.bf16.msra.mxu0 %v2944_v29  ;;  %v1409_v49 = vmax.f32 %v3603_v22, 0.0  ;;  %v3963_v22 = vld [vmem:[#allocation13_spill] sm:$0xff]  ;;  %v3966_v29 = vld [vmem:[#allocation6_spill] sm:$0xff] }
 0x441   :  { %2948 = vmatprep.subr.bf16.mxu0 %v3956_v30  ;;  %v1420_v54 = vmax.f32 %v3963_v22, 0.0 }
 0x443   :  { %2806 = vmatmul.mubr.msk.f32.gmra.mrb[22].mxu0 %vm508_vm4, %v3277_v52  ;;  %v1410_v52 = vmax.f32 %v3598_v57, 0.0  ;;  %v1419_v57 = vmax.f32 %v3662_v36, 0.0 }
 0x444   :  { %2808 = vmatprep.mubr.msk.f32.mxu0 %vm508_vm4, %v3288_v62  ;;  %v1411_v62 = vmax.f32 %v3622_v59, 0.0  ;;  %v3964_v59 = vmov 0.0  }
 0x447   :  { %2809 = vmatmul.mubr.msk.f32.gmra.mrb[24].mxu0 %vm508_vm4, %v3291_v1  ;;  %v3957_v1 = vld [vmem:[#allocation7_spill] sm:$0xff] }
 0x448   :  { %2811 = vmatprep.mubr.msk.f32.mxu0 %vm508_vm4, %v3299_v7  ;;  %v1412_v7 = vmax.f32 %v3957_v1, 0.0 }
 0x44b   :  { %2812 = vmatmul.mubr.msk.f32.gmra.mrb[26].mxu0 %vm508_vm4, %v3301_v10  ;;  %v3958_v10 = vld [vmem:[#allocation9_spill] sm:$0xff] }
 0x44c   :  { %2814 = vmatprep.mubr.msk.f32.mxu0 %vm508_vm4, %v3309_v14  ;;  %v1413_v14 = vmax.f32 %v3958_v10, 0.0 }
 0x44f   :  { %2815 = vmatmul.mubr.msk.f32.gmra.mrb[28].mxu0 %vm508_vm4, %v3311_v16  ;;  %v3959_v16 = vld [vmem:[#allocation8_spill] sm:$0xff] }
 0x450   :  { %2817 = vmatprep.mubr.msk.f32.mxu0 %vm508_vm4, %v3322_v25  ;;  %v1414_v25 = vmax.f32 %v3959_v16, 0.0 }
 0x453   :  { %2818 = vmatmul.mubr.msk.f32.gmra.mrb[30].mxu0 %vm508_vm4, %v3325_v31  ;;  %v1415_v31 = vmax.f32 %v3654_v44, 0.0  ;;  %v2144_v44 = vld [vmem:[%s3900_s11] sm:$0xff] }
 0x454   :  { %2820 = vmatprep.mubr.msk.f32.mxu0 %vm508_vm4, %v3336_v45  ;;  %v3960_v45 = vld [vmem:[#allocation12_spill] sm:$0xff]  ;;  %v2949_v36 = vpack.c.bf16 %v2145_v58, %v2144_v44 }
 0x457   :  { %2821 = vmatmul.mubr.msk.f32.gmra.mrb[32].mxu0 %vm508_vm4, %v3339_v28  ;;  %v1416_v28 = vmax.f32 %v3960_v45, 0.0 }
 0x458   :  { %2831 = vmatprep.mubr.msk.f32.mxu0 %vm508_vm4, %v1405_v33 }
 0x45b   :  { %2832 = vmatmul.mubr.msk.f32.vlgmr.msra.gmra.mrb[18].mxu0 %vm508_vm4, %v1406_v35 }
 0x45c   :  { %2834 = vmatprep.mubr.msk.f32.mxu0 %vm508_vm4, %v1407_v39  ;;  %2950 = vmatpush3.bf16.msra.mxu0 %v2949_v36 }
 0x45d   :  { %2951 = vmatprep.subr.bf16.mxu0 %v3956_v30 }
 0x45f   :  { %2835 = vmatmul.mubr.msk.f32.gmra.mrb[20].mxu0 %vm508_vm4, %v1408_v41 }
 0x460   :  { %2837 = vmatprep.mubr.msk.f32.mxu0 %vm508_vm4, %v1409_v49  ;;  %2953 = vmatpush3.bf16.msra.mxu0 %v2952_v61 }
 0x463   :  { %2838 = vmatmul.mubr.msk.f32.gmra.mrb[22].mxu0 %vm508_vm4, %v1410_v52 }
 0x464   :  { %2840 = vmatprep.mubr.msk.f32.mxu0 %vm508_vm4, %v1411_v62 }
 0x467   :  { %2841 = vmatmul.mubr.msk.f32.gmra.mrb[24].mxu0 %vm508_vm4, %v1412_v7 }
 0x468   :  { %2843 = vmatprep.mubr.msk.f32.mxu0 %vm508_vm4, %v1413_v14 }
 0x46b   :  { %2844 = vmatmul.mubr.msk.f32.gmra.mrb[26].mxu0 %vm508_vm4, %v1414_v25 }
 0x46c   :  { %2846 = vmatprep.mubr.msk.f32.mxu0 %vm508_vm4, %v1415_v31 }
 0x46f   :  { %2847 = vmatmul.mubr.msk.f32.gmra.mrb[28].mxu0 %vm508_vm4, %v1416_v28 }
 0x470   :  { %2849 = vmatprep.mubr.msk.f32.mxu0 %vm508_vm4, %v1417_v50 }
 0x473   :  { %2850 = vmatmul.mubr.msk.f32.gmra.mrb[30].mxu0 %vm508_vm4, %v1418_v5 }
 0x474   :  { %2852 = vmatprep.mubr.msk.f32.mxu0 %vm508_vm4, %v1419_v57 }
 0x477   :  { %2853 = vmatmul.mubr.msk.f32.gmra.mrb[32].mxu0 %vm508_vm4, %v1420_v54 }
 0x478   :  { %2863 = vmatprep.mubr.msk.f32.mxu0 %vm3031_vm3, %v3964_v59 }
 0x4e6   :  { %v1538_v13 = vpop.f32.mrb[16].mxu0 }
 0x4e7   :  { %v2758_v42 = vpop.f32.mrb[17].mxu0  ;;  %v2056_v43 = vrot.slane %v1538_v13, %v3965_v38  ;;  %v2068_v30 = vrot.slane %v1538_v13, %v3966_v29 }
 0x52e   :  { %v2833_v6 = vpop.f32.mrb[18].mxu0 }
 0x52f   :  { %v2058_v37 = vadd.f32 %v2833_v6, %v2056_v43  ;;  %v1958_v63 = vpop.f32.mrb[19].mxu0 }
 0x530   :  { %v2057_v48 = vadd.f32 %v2056_v43, %v1958_v63 }
 0x531   :  { %v2085_v8 = vadd.f32 %v3837_v4, %v2058_v37 }
 0x532   :  { %v2836_v40 = vpop.f32.mrb[20].mxu0  ;;  %v2084_v46 = vadd.f32 %v3837_v4, %v2057_v48 }
 0x533   :  { %v2060_v27 = vadd.f32 %v2836_v40, %v2056_v43  ;;  %v1968_v51 = vpop.f32.mrb[21].mxu0  ;;  %v2101_v11 = vsel %vm508_vm4, %v2085_v8, -inf }
 0x534   :  { %v2059_v3 = vadd.f32 %v2056_v43, %v1968_v51  ;;  %v2100_v15 = vsel %vm508_vm4, %v2084_v46, -inf }
 0x535   :  { %v2087_v17 = vadd.f32 %v3837_v4, %v2060_v27 }
 0x536   :  { %v2839_v34 = vpop.f32.mrb[22].mxu0  ;;  %v2086_v21 = vadd.f32 %v3837_v4, %v2059_v3 }
 0x537   :  { %v2062_v2 = vadd.f32 %v2839_v34, %v2056_v43  ;;  %v1978_v56 = vpop.f32.mrb[23].mxu0  ;;  %v2103_v49 = vsel %vm508_vm4, %v2087_v17, -inf }
 0x538   :  { %v2061_v55 = vadd.f32 %v2056_v43, %v1978_v56  ;;  %v2102_v10 = vsel %vm508_vm4, %v2086_v21, -inf }
 0x539   :  { %v2089_v9 = vadd.f32 %v3837_v4, %v2062_v2 }
 0x53a   :  { %v2088_v60 = vadd.f32 %v3837_v4, %v2061_v55  ;;  %v2842_v12 = vpop.f32.mrb[24].mxu0 }
 0x53b   :  { %v2106_v18 = vsel %vm508_vm4, %v2089_v9, -inf  ;;  %v2064_v19 = vadd.f32 %v2842_v12, %v2056_v43  ;;  %v1988_v20 = vpop.f32.mrb[25].mxu0 }
 0x53c   :  { %v2107_v23 = vmax.f32 %v2101_v11, %v2106_v18  ;;  %v2104_v24 = vsel %vm508_vm4, %v2088_v60, -inf  ;;  %v2063_v26 = vadd.f32 %v2056_v43, %v1988_v20 }
 0x53d   :  { %v2105_v33 = vmax.f32 %v2100_v15, %v2104_v24  ;;  %v2091_v35 = vadd.f32 %v3837_v4, %v2064_v19 }
 0x53e   :  { %v2090_v39 = vadd.f32 %v3837_v4, %v2063_v26  ;;  %v2845_v41 = vpop.f32.mrb[26].mxu0 }
 0x53f   :  { %v2112_v52 = vmax.f32 %v2105_v33, %v2107_v23  ;;  %v2110_v62 = vsel %vm508_vm4, %v2091_v35, -inf  ;;  %v2070_v1 = vadd.f32 %v2845_v41, %v2068_v30  ;;  %v1998_v7 = vpop.f32.mrb[27].mxu0  ;;  %v2381_v35 = vld [vmem:[%s3901_s12] ss:$0 sm:$0xff] }
 0x540   :  { %v2111_v14 = vmax.f32 %v2103_v49, %v2110_v62  ;;  %v2108_v16 = vsel %vm508_vm4, %v2090_v39, -inf  ;;  %v2069_v25 = vadd.f32 %v2068_v30, %v1998_v7 }
 0x541   :  { %v2109_v31 = vmax.f32 %v2102_v10, %v2108_v16  ;;  %v2093_v57 = vadd.f32 %v3837_v4, %v2070_v1 }
 0x542   :  { %v2848_v45 = vpop.f32.mrb[28].mxu0  ;;  %v2092_v54 = vadd.f32 %v3837_v4, %v2069_v25 }
 0x543   :  { %v2113_v28 = vmax.f32 %v2109_v31, %v2111_v14  ;;  %v2072_v32 = vadd.f32 %v2848_v45, %v2068_v30  ;;  %v2008_v50 = vpop.f32.mrb[29].mxu0  ;;  %v2122_v53 = vsel %vm508_vm4, %v2093_v57, -inf }
 0x544   :  { %v2071_v0 = vadd.f32 %v2068_v30, %v2008_v50  ;;  %v2121_v13 = vsel %vm508_vm4, %v2092_v54, -inf }
 0x545   :  { %v2114_v5 = vmax.f32 %v2112_v52, %v2113_v28  ;;  %v2095_v42 = vadd.f32 %v3837_v4, %v2072_v32 }
 0x546   :  { %v2851_v22 = vpop.f32.mrb[30].mxu0  ;;  %v2094_v37 = vadd.f32 %v3837_v4, %v2071_v0 }
 0x547   :  { %v2074_v59 = vadd.f32 %v2851_v22, %v2068_v30  ;;  %v2018_v44 = vpop.f32.mrb[31].mxu0  ;;  %v2115_v27 = vrot.slane %v2114_v5, 4  ;;  %v2124_v34 = vsel %vm508_vm4, %v2095_v42, -inf }
 0x548   :  { %v2073_v58 = vadd.f32 %v2068_v30, %v2018_v44  ;;  %v2123_v56 = vsel %vm508_vm4, %v2094_v37, -inf }
 0x549   :  { %v2097_v36 = vadd.f32 %v3837_v4, %v2074_v59  ;;  %v2116_v11 = vmax.f32 %v2114_v5, %v2115_v27 }
 0x54a   :  { %v2096_v47 = vadd.f32 %v3837_v4, %v2073_v58  ;;  %v2854_v61 = vpop.f32.mrb[32].mxu0 }
 0x54b   :  { %v2127_v38 = vsel %vm508_vm4, %v2097_v36, -inf  ;;  %v2076_v43 = vadd.f32 %v2854_v61, %v2068_v30  ;;  %v2028_v6 = vpop.f32.mrb[33].mxu0  ;;  %v2117_v15 = vrot.slane %v2116_v11, 2 }
 0x54c   :  { %v2128_v63 = vmax.f32 %v2122_v53, %v2127_v38  ;;  %v2125_v48 = vsel %vm508_vm4, %v2096_v47, -inf  ;;  %v2075_v40 = vadd.f32 %v2068_v30, %v2028_v6 }
 0x54d   :  { %v2126_v51 = vmax.f32 %v2121_v13, %v2125_v48  ;;  %v2099_v3 = vadd.f32 %v3837_v4, %v2076_v43  ;;  %v2118_v19 = vmax.f32 %v2116_v11, %v2117_v15 }
 0x54e   :  { %v2098_v8 = vadd.f32 %v3837_v4, %v2075_v40 }
 0x54f   :  { %v2133_v46 = vmax.f32 %v2126_v51, %v2128_v63  ;;  %v2131_v2 = vsel %vm508_vm4, %v2099_v3, -inf  ;;  %v2119_v4 = vrot.slane %v2118_v19, 1 }
 0x550   :  { %v2132_v55 = vmax.f32 %v2124_v34, %v2131_v2  ;;  %v2129_v9 = vsel %vm508_vm4, %v2098_v8, -inf }
 0x551   :  { %v2130_v60 = vmax.f32 %v2123_v56, %v2129_v9  ;;  %v2120_v26 = vmax.f32 %v2118_v19, %v2119_v4 }
 0x553   :  { %v2134_v12 = vmax.f32 %v2130_v60, %v2132_v55 }
 0x555   :  { %v2135_v17 = vmax.f32 %v2133_v46, %v2134_v12 }
 0x557   :  { %v2136_v18 = vrot.slane %v2135_v17, 4 }
 0x559   :  { %v2137_v20 = vmax.f32 %v2135_v17, %v2136_v18 }
 0x55b   :  { %v2138_v21 = vrot.slane %v2137_v20, 2 }
 0x55d   :  { %v2139_v23 = vmax.f32 %v2137_v20, %v2138_v21 }
 0x55f   :  { %v2140_v24 = vrot.slane %v2139_v23, 1 }
 0x561   :  { %v2141_v29 = vmax.f32 %v2139_v23, %v2140_v24 }
 0x563   :  { %v2142_v30 = vsel %vm551_vm5, %v2120_v26, %v2141_v29 }
 0x564   :  { %v2143_v33 = vmax.f32 %v2142_v30, 0.0 }
 0x566   :  { %2864 = vmatmul.mubr.msk.f32.vlgmr.msra.gmra.mrb[34].mxu0 %vm508_vm4, %v2143_v33 }
 0x639   :  { %v2224_v39 = vpop.f32.mrb[34].mxu0 }
 0x63a   :  { %v2225_v41 = vadd.f32 %v2381_v35, %v2224_v39  ;;  %v2865_v49 = vpop.f32.mrb[35].mxu0 }
 0x63c   :  { %2229 = vst.msk [vmem:[#allocation2] sm:$0x3] %vm2228_vm6, %v2225_v41 }
 0x63d   :  { %3017 = shalt.err (!%p3014_p4)
}
 0x63e   :  { %s3018_s17 = scalar_lea.hbm %s3902_s13, 32 }
 0x63f   :  { %p3019_p5 = scmp.ne.s32.totalorder %s3902_s13, %s3018_s17  ;;  %p3022_p6 = scmp.lt.u32.totalorder %s3018_s17, %s3902_s13 }
 0x641   :  { %p3024_p7 = pnand %p3022_p6, %p3019_p5 }
 0x643   :  { %3027 = shalt.err (!%p3024_p7)
}
 0x644   :  { %2239 = dma.vmem_to_hbm [thread:$0]  %s2237_s14, 32, %s3902_s13, [#allocation3]  }
 0x645   :  { %3028 = dma.done.wait [#allocation3], 32  }
 0x646   :  { %3029 = vsyncadd [#allocation3], 4294967264 }
 0x647   :  { %2243 = vsyncpa [#allocation3], 1 }

</bundles_post_ra>
